<compile_context>
chip_gen: v7x
topology: tpu7x:2x2x1
jax: 0.10.0
libtpu: 0.0.40
codegen_flags: <defaults>
</compile_context>

<pallas_src>
import functools

import jax
import jax.numpy as jnp
import numpy as np
from jax.experimental import pallas as pl
from jax.experimental.pallas import tpu as pltpu

EPS = 1e-5


def _bottleneck_kernel(x_ref, w1_ref, b1_ref,
                       w2_ref, b2_ref,
                       w3_ref, b3_ref,
                       o_ref, pad_ref, *, H, W, Cin, P):
    """One batch element per grid step.  All convs run on the MXU in bf16."""
    f32 = jnp.float32
    bf16 = jnp.bfloat16

    x = x_ref[0]                                   # (H, W, Cin) f32
    xm = x.reshape(H * W, Cin)

    # ---- conv1 (1x1) + bn1 + relu  (BN scale pre-folded into w1) ----------
    y1 = jnp.dot(xm.astype(bf16), w1_ref[...],
                 preferred_element_type=f32)       # (H*W, P), f32 accumulate
    y1 = jnp.maximum(y1 + b1_ref[...], 0.0)

    # ---- pack conv2 input: dx-shifted copies along the channel axis -------
    # pad_ref is ((H+2)*W, 3P) bf16.  Row block [W, (H+1)*W) holds, for each
    # spatial position (h, w):  [ y1[h, w-1] | y1[h, w] | y1[h, w+1] ]
    # (out-of-range columns are zero).  Row blocks [0, W) and [(H+1)*W, ...)
    # are the zero rows for the conv's H boundary; they are re-zeroed every
    # step (2*W rows only) so correctness holds when the batch grid axis is
    # sharded across TensorCores.
    y1b = y1.reshape(H, W, P).astype(bf16)
    zc = jnp.zeros((H, 1, P), bf16)
    wm1 = jnp.concatenate([zc, y1b[:, :W - 1, :]], axis=1)     # y1[h, w-1]
    wp1 = jnp.concatenate([y1b[:, 1:, :], zc], axis=1)         # y1[h, w+1]
    packed = jnp.concatenate([wm1, y1b, wp1], axis=-1)         # (H, W, 3P)

    pad_ref[0:W] = jnp.zeros((W, 3 * P), bf16)
    pad_ref[(H + 1) * W:(H + 2) * W] = jnp.zeros((W, 3 * P), bf16)
    pad_ref[W:(H + 1) * W] = packed.reshape(H * W, 3 * P)

    # ---- conv2 (3x3, stride=1, pad=1): 3 fused matmuls (one per dy) --------
    # (bn2 scale pre-folded into w2 columns; accumulate in vregs.)
    acc = jnp.dot(pad_ref[0:H * W], w2_ref[0],
                  preferred_element_type=f32)                  # dy = -1
    acc = acc + jnp.dot(pad_ref[W:(H + 1) * W], w2_ref[1],
                        preferred_element_type=f32)            # dy =  0
    acc = acc + jnp.dot(pad_ref[2 * W:(H + 2) * W], w2_ref[2],
                        preferred_element_type=f32)            # dy = +1
    y2 = jnp.maximum(acc + b2_ref[...], 0.0)

    # ---- conv3 (1x1) + bn3, identity residual, relu ------------------------
    y3 = jnp.dot(y2.astype(bf16), w3_ref[...],
                 preferred_element_type=f32)       # (H*W, 4P)
    o_ref[0] = jnp.maximum(y3 + b3_ref[...] + xm, 0.0).reshape(H, W, Cin)


def _fold_bn(gamma, beta, mean, var):
    scale = (gamma / jnp.sqrt(var + EPS)).astype(jnp.float32)
    bias = (beta - mean * scale).astype(jnp.float32)
    return scale, bias


def bottleneck_forward_nhwc(x, params, *, vmem_limit_bytes=None):
    """x: (N, H, W, Cin) float32 NHWC.  Returns (N, H, W, Cin) float32."""
    N, H, W, Cin = x.shape

    s1, b1 = _fold_bn(*params["bn1"])
    s2, b2 = _fold_bn(*params["bn2"])
    s3, b3 = _fold_bn(*params["bn3"])

    # Conv weights reshaped to matmul layouts, BN scale folded into the output
    # channel columns (f32), then cast to bf16 for the MXU.
    w1 = jnp.transpose(params["conv1"][:, :, 0, 0], (1, 0))            # (Cin, P)
    P = w1.shape[1]
    assert Cin == 4 * P, (
        "identity residual requires inplanes == 4*planes "
        "(stride=1, downsample=None Bottleneck variant)")
    w1 = (w1 * s1[None, :]).astype(jnp.bfloat16)                       # (Cin, P)

    # (kh, kw, in, out): pack the 3 kw taps along the reduction axis.
    w2 = jnp.transpose(params["conv2"], (2, 3, 1, 0)).reshape(3, 3 * P, P)
    w2 = (w2 * s2[None, None, :]).astype(jnp.bfloat16)                 # (3, 3P, P)

    w3 = jnp.transpose(params["conv3"][:, :, 0, 0], (1, 0))            # (P, 4P)
    w3 = (w3 * s3[None, :]).astype(jnp.bfloat16)

    b1 = b1[None, :]                                                   # (1, P)
    b2 = b2[None, :]                                                   # (1, P)
    b3 = b3[None, :]                                                   # (1, 4P)

    const = lambda ndim: (lambda n: (0,) * ndim)   # constant-block index maps

    # NOTE: W should be a multiple of 8 (f32) / 16 (bf16) so the (H,W,C) <->
    # (H*W,C) reshapes and the W-row-offset slices of pad_ref are layout
    # no-ops; true for standard ResNet stages.
    out = pl.pallas_call(
        functools.partial(_bottleneck_kernel, H=H, W=W, Cin=Cin, P=P),
        out_shape=jax.ShapeDtypeStruct((N, H, W, Cin), jnp.float32),
        grid_spec=pltpu.PrefetchScalarGridSpec(
            num_scalar_prefetch=0,
            grid=(N,),
            in_specs=[
                pl.BlockSpec((1, H, W, Cin), lambda n: (n, 0, 0, 0)),   # x
                pl.BlockSpec((Cin, P), const(2)),                       # w1 (bf16, bn-folded)
                pl.BlockSpec((1, P), const(2)),                         # b1
                pl.BlockSpec((3, 3 * P, P), const(3)),                  # w2 packed (bf16, bn-folded)
                pl.BlockSpec((1, P), const(2)),                         # b2
                pl.BlockSpec((P, 4 * P), const(2)),                     # w3 (bf16, bn-folded)
                pl.BlockSpec((1, 4 * P), const(2)),                     # b3
            ],
            out_specs=pl.BlockSpec((1, H, W, Cin), lambda n: (n, 0, 0, 0)),
            scratch_shapes=[
                pltpu.VMEM(((H + 2) * W, 3 * P), jnp.bfloat16),  # packed, H-padded conv2 input
            ],
        ),
        compiler_params=pltpu.CompilerParams(
            dimension_semantics=("parallel",),
            vmem_limit_bytes=vmem_limit_bytes),
    )(x, w1, b1, w2, b2, w3, b3)
    return out


def bottleneck_forward(x_nchw, params):
    """PyTorch-convention entry point: (N, Cin, H, W) in / out.

    In a real model keep activations NHWC and call bottleneck_forward_nhwc
    directly; the transposes here exist only for standalone NCHW parity.
    """
    x = jnp.transpose(x_nchw, (0, 2, 3, 1))        # -> NHWC
    out = bottleneck_forward_nhwc(x, params)
    return jnp.transpose(out, (0, 3, 1, 2))        # -> NCHW


# ----------------------- pure-JAX reference (NCHW, f32) -----------------------
def bottleneck_reference(x, p):
    hi = jax.lax.Precision.HIGHEST

    def conv(a, w, padding):
        return jax.lax.conv_general_dilated(
            a, w, (1, 1), padding,
            dimension_numbers=("NCHW", "OIHW", "NCHW"), precision=hi)

    def bn(a, stats):
        g, b, m, v = stats
        g, b, m, v = (t[None, :, None, None] for t in (g, b, m, v))
        return g * (a - m) / jnp.sqrt(v + EPS) + b

    out = jax.nn.relu(bn(conv(x, p["conv1"], "VALID"), p["bn1"]))
    out = jax.nn.relu(bn(conv(out, p["conv2"], [(1, 1), (1, 1)]), p["bn2"]))
    out = bn(conv(out, p["conv3"], "VALID"), p["bn3"])
    return jax.nn.relu(out + x)


def make_params(key, inplanes, planes):
    ks = jax.random.split(key, 12)
    p = {
        "conv1": 0.1 * jax.random.normal(ks[0], (planes, inplanes, 1, 1), jnp.float32),
        "conv2": 0.1 * jax.random.normal(ks[1], (planes, planes, 3, 3), jnp.float32),
        "conv3": 0.1 * jax.random.normal(ks[2], (planes * 4, planes, 1, 1), jnp.float32),
        "bn1": (1.0 + 0.1 * jax.random.normal(ks[3], (planes,), jnp.float32),
                0.1 * jax.random.normal(ks[4], (planes,), jnp.float32),
                0.1 * jax.random.normal(ks[5], (planes,), jnp.float32),
                0.5 + jax.random.uniform(ks[6], (planes,), jnp.float32)),
        "bn2": (1.0 + 0.1 * jax.random.normal(ks[7], (planes,), jnp.float32),
                0.1 * jax.random.normal(ks[8], (planes,), jnp.float32),
                0.1 * jax.random.normal(ks[9], (planes,), jnp.float32),
                0.5 + jax.random.uniform(ks[10], (planes,), jnp.float32)),
        "bn3": (1.0 + 0.1 * jax.random.normal(ks[11], (planes * 4,), jnp.float32),
                jnp.zeros((planes * 4,), jnp.float32),
                jnp.zeros((planes * 4,), jnp.float32),
                jnp.ones((planes * 4,), jnp.float32)),
    }
    return p


if __name__ == "__main__":
    N, planes, HW = 2, 8, 16
    inplanes = planes * 4                          # identity residual requires Cin == 4*planes
    key = jax.random.PRNGKey(0)
    kx, kp = jax.random.split(key)

    x = jax.random.normal(kx, (N, inplanes, HW, HW), jnp.float32)   # NCHW like PyTorch
    params = make_params(kp, inplanes, planes)

    out = jax.block_until_ready(bottleneck_forward(x, params))
    ref = jax.block_until_ready(bottleneck_reference(x, params))

    assert out.shape == (N, inplanes, HW, HW), out.shape
    # bf16 matmul operands (f32 accumulation) -> loosened tolerance vs f32 ref.
    np.testing.assert_allclose(np.asarray(out), np.asarray(ref), atol=2e-2, rtol=2e-2)
    print("KERNEL_OK")
</pallas_src>

<mosaic_0001>
module attributes {stable_mosaic.version = 11 : i64} {
  func.func @_bottleneck_kernel(%arg0: i32, %arg1: memref<1x16x16x32xf32, #tpu.memory_space<vmem>>, %arg2: memref<32x8xbf16, #tpu.memory_space<vmem>>, %arg3: memref<1x8xf32, #tpu.memory_space<vmem>>, %arg4: memref<3x24x8xbf16, #tpu.memory_space<vmem>>, %arg5: memref<1x8xf32, #tpu.memory_space<vmem>>, %arg6: memref<8x32xbf16, #tpu.memory_space<vmem>>, %arg7: memref<1x32xf32, #tpu.memory_space<vmem>>, %arg8: memref<1x16x16x32xf32, #tpu.memory_space<vmem>>, %arg9: memref<288x24xbf16, #tpu.memory_space<vmem>>) attributes {dimension_semantics = [#tpu.dimension_semantics<parallel>], iteration_bounds = array<i64: 2>, scalar_prefetch = 0 : i64, scratch_operands = 1 : i64, tpu.core_type = #tpu.core_type<tc>, window_params = [{transform_indices = @transform_0, window_bounds = array<i64: 1, 16, 16, 32>}, {pipeline_mode = #tpu.pipeline_mode<synchronous>, transform_indices = @transform_1, window_bounds = array<i64: 32, 8>}, {pipeline_mode = #tpu.pipeline_mode<synchronous>, transform_indices = @transform_2, window_bounds = array<i64: 1, 8>}, {pipeline_mode = #tpu.pipeline_mode<synchronous>, transform_indices = @transform_3, window_bounds = array<i64: 3, 24, 8>}, {pipeline_mode = #tpu.pipeline_mode<synchronous>, transform_indices = @transform_4, window_bounds = array<i64: 1, 8>}, {pipeline_mode = #tpu.pipeline_mode<synchronous>, transform_indices = @transform_5, window_bounds = array<i64: 8, 32>}, {pipeline_mode = #tpu.pipeline_mode<synchronous>, transform_indices = @transform_6, window_bounds = array<i64: 1, 32>}, {transform_indices = @transform_7, window_bounds = array<i64: 1, 16, 16, 32>}]} {
    %c0 = arith.constant 0 : index
    %c0_0 = arith.constant 0 : index
    %c0_1 = arith.constant 0 : index
    %c0_2 = arith.constant 0 : index
    %0 = vector.load %arg1[%c0, %c0_0, %c0_1, %c0_2] : memref<1x16x16x32xf32, #tpu.memory_space<vmem>>, vector<1x16x16x32xf32>
    %1 = vector.shape_cast %0 : vector<1x16x16x32xf32> to vector<16x16x32xf32>
    %2 = vector.shape_cast %1 : vector<16x16x32xf32> to vector<256x32xf32>
    %3 = arith.truncf %2 : vector<256x32xf32> to vector<256x32xbf16>
    %c0_3 = arith.constant 0 : index
    %c0_4 = arith.constant 0 : index
    %4 = vector.load %arg2[%c0_3, %c0_4] : memref<32x8xbf16, #tpu.memory_space<vmem>>, vector<32x8xbf16>
    %cst = arith.constant dense<0.000000e+00> : vector<256x8xf32>
    %5 = tpu.matmul %3, %4, %cst {dimension_numbers = #tpu.dot_dimension_numbers<[1], [0], [0], [1], [0, 0, 1, 1], [], []>} : vector<256x32xbf16>, vector<32x8xbf16>, vector<256x8xf32> -> vector<256x8xf32>
    %c0_5 = arith.constant 0 : index
    %c0_6 = arith.constant 0 : index
    %6 = vector.load %arg3[%c0_5, %c0_6] : memref<1x8xf32, #tpu.memory_space<vmem>>, vector<1x8xf32>
    %7 = vector.broadcast %6 : vector<1x8xf32> to vector<256x8xf32>
    %8 = arith.addf %5, %7 : vector<256x8xf32>
    %cst_7 = arith.constant 0.000000e+00 : f32
    %9 = vector.broadcast %cst_7 : f32 to vector<256x8xf32>
    %10 = arith.maximumf %8, %9 : vector<256x8xf32>
    %11 = vector.shape_cast %10 : vector<256x8xf32> to vector<16x16x8xf32>
    %12 = arith.truncf %11 : vector<16x16x8xf32> to vector<16x16x8xbf16>
    %cst_8 = arith.constant 0.000000e+00 : bf16
    %13 = vector.broadcast %cst_8 : bf16 to vector<16x1x8xbf16>
    %14 = vector.extract_strided_slice %12 {offsets = [0, 0, 0], sizes = [16, 15, 8], strides = [1, 1, 1]} : vector<16x16x8xbf16> to vector<16x15x8xbf16>
    %15 = tpu.concatenate %13, %14 in 1 : vector<16x1x8xbf16>, vector<16x15x8xbf16> -> vector<16x16x8xbf16>
    %16 = vector.extract_strided_slice %12 {offsets = [0, 1, 0], sizes = [16, 15, 8], strides = [1, 1, 1]} : vector<16x16x8xbf16> to vector<16x15x8xbf16>
    %17 = tpu.concatenate %16, %13 in 1 : vector<16x15x8xbf16>, vector<16x1x8xbf16> -> vector<16x16x8xbf16>
    %18 = tpu.concatenate %15, %12, %17 in 2 : vector<16x16x8xbf16>, vector<16x16x8xbf16>, vector<16x16x8xbf16> -> vector<16x16x24xbf16>
    %cst_9 = arith.constant 0.000000e+00 : bf16
    %19 = vector.broadcast %cst_9 : bf16 to vector<16x24xbf16>
    %c0_10 = arith.constant 0 : index
    %c0_11 = arith.constant 0 : index
    %20 = vector.load %arg9[%c0_10, %c0_11] : memref<288x24xbf16, #tpu.memory_space<vmem>>, vector<16x24xbf16>
    tpu.vector_store %arg9[%c0_10, %c0_11], %19 {strides = array<i32>} : memref<288x24xbf16, #tpu.memory_space<vmem>>, vector<16x24xbf16>,
    %cst_12 = arith.constant 0.000000e+00 : bf16
    %21 = vector.broadcast %cst_12 : bf16 to vector<16x24xbf16>
    %c272 = arith.constant 272 : index
    %c0_13 = arith.constant 0 : index
    %22 = vector.load %arg9[%c272, %c0_13] : memref<288x24xbf16, #tpu.memory_space<vmem>>, vector<16x24xbf16>
    tpu.vector_store %arg9[%c272, %c0_13], %21 {strides = array<i32>} : memref<288x24xbf16, #tpu.memory_space<vmem>>, vector<16x24xbf16>,
    %23 = vector.shape_cast %18 : vector<16x16x24xbf16> to vector<256x24xbf16>
    %c16 = arith.constant 16 : index
    %c0_14 = arith.constant 0 : index
    %24 = vector.load %arg9[%c16, %c0_14] : memref<288x24xbf16, #tpu.memory_space<vmem>>, vector<256x24xbf16>
    tpu.vector_store %arg9[%c16, %c0_14], %23 {strides = array<i32>} : memref<288x24xbf16, #tpu.memory_space<vmem>>, vector<256x24xbf16>,
    %c0_15 = arith.constant 0 : index
    %c0_16 = arith.constant 0 : index
    %25 = vector.load %arg9[%c0_15, %c0_16] : memref<288x24xbf16, #tpu.memory_space<vmem>>, vector<256x24xbf16>
    %c0_17 = arith.constant 0 : index
    %c0_18 = arith.constant 0 : index
    %c0_19 = arith.constant 0 : index
    %26 = vector.load %arg4[%c0_17, %c0_18, %c0_19] : memref<3x24x8xbf16, #tpu.memory_space<vmem>>, vector<1x24x8xbf16>
    %27 = vector.shape_cast %26 : vector<1x24x8xbf16> to vector<24x8xbf16>
    %cst_20 = arith.constant dense<0.000000e+00> : vector<256x8xf32>
    %28 = tpu.matmul %25, %27, %cst_20 {dimension_numbers = #tpu.dot_dimension_numbers<[1], [0], [0], [1], [0, 0, 1, 1], [], []>} : vector<256x24xbf16>, vector<24x8xbf16>, vector<256x8xf32> -> vector<256x8xf32>
    %c16_21 = arith.constant 16 : index
    %c0_22 = arith.constant 0 : index
    %29 = vector.load %arg9[%c16_21, %c0_22] : memref<288x24xbf16, #tpu.memory_space<vmem>>, vector<256x24xbf16>
    %c1 = arith.constant 1 : index
    %c0_23 = arith.constant 0 : index
    %c0_24 = arith.constant 0 : index
    %30 = vector.load %arg4[%c1, %c0_23, %c0_24] : memref<3x24x8xbf16, #tpu.memory_space<vmem>>, vector<1x24x8xbf16>
    %31 = vector.shape_cast %30 : vector<1x24x8xbf16> to vector<24x8xbf16>
    %cst_25 = arith.constant dense<0.000000e+00> : vector<256x8xf32>
    %32 = tpu.matmul %29, %31, %cst_25 {dimension_numbers = #tpu.dot_dimension_numbers<[1], [0], [0], [1], [0, 0, 1, 1], [], []>} : vector<256x24xbf16>, vector<24x8xbf16>, vector<256x8xf32> -> vector<256x8xf32>
    %33 = arith.addf %28, %32 : vector<256x8xf32>
    %c32 = arith.constant 32 : index
    %c0_26 = arith.constant 0 : index
    %34 = vector.load %arg9[%c32, %c0_26] : memref<288x24xbf16, #tpu.memory_space<vmem>>, vector<256x24xbf16>
    %c2 = arith.constant 2 : index
    %c0_27 = arith.constant 0 : index
    %c0_28 = arith.constant 0 : index
    %35 = vector.load %arg4[%c2, %c0_27, %c0_28] : memref<3x24x8xbf16, #tpu.memory_space<vmem>>, vector<1x24x8xbf16>
    %36 = vector.shape_cast %35 : vector<1x24x8xbf16> to vector<24x8xbf16>
    %cst_29 = arith.constant dense<0.000000e+00> : vector<256x8xf32>
    %37 = tpu.matmul %34, %36, %cst_29 {dimension_numbers = #tpu.dot_dimension_numbers<[1], [0], [0], [1], [0, 0, 1, 1], [], []>} : vector<256x24xbf16>, vector<24x8xbf16>, vector<256x8xf32> -> vector<256x8xf32>
    %38 = arith.addf %33, %37 : vector<256x8xf32>
    %c0_30 = arith.constant 0 : index
    %c0_31 = arith.constant 0 : index
    %39 = vector.load %arg5[%c0_30, %c0_31] : memref<1x8xf32, #tpu.memory_space<vmem>>, vector<1x8xf32>
    %40 = vector.broadcast %39 : vector<1x8xf32> to vector<256x8xf32>
    %41 = arith.addf %38, %40 : vector<256x8xf32>
    %cst_32 = arith.constant 0.000000e+00 : f32
    %42 = vector.broadcast %cst_32 : f32 to vector<256x8xf32>
    %43 = arith.maximumf %41, %42 : vector<256x8xf32>
    %44 = arith.truncf %43 : vector<256x8xf32> to vector<256x8xbf16>
    %c0_33 = arith.constant 0 : index
    %c0_34 = arith.constant 0 : index
    %45 = vector.load %arg6[%c0_33, %c0_34] : memref<8x32xbf16, #tpu.memory_space<vmem>>, vector<8x32xbf16>
    %cst_35 = arith.constant dense<0.000000e+00> : vector<256x32xf32>
    %46 = tpu.matmul %44, %45, %cst_35 {dimension_numbers = #tpu.dot_dimension_numbers<[1], [0], [0], [1], [0, 0, 1, 1], [], []>} : vector<256x8xbf16>, vector<8x32xbf16>, vector<256x32xf32> -> vector<256x32xf32>
    %c0_36 = arith.constant 0 : index
    %c0_37 = arith.constant 0 : index
    %47 = vector.load %arg7[%c0_36, %c0_37] : memref<1x32xf32, #tpu.memory_space<vmem>>, vector<1x32xf32>
    %48 = vector.broadcast %47 : vector<1x32xf32> to vector<256x32xf32>
    %49 = arith.addf %46, %48 : vector<256x32xf32>
    %50 = arith.addf %49, %2 : vector<256x32xf32>
    %cst_38 = arith.constant 0.000000e+00 : f32
    %51 = vector.broadcast %cst_38 : f32 to vector<256x32xf32>
    %52 = arith.maximumf %50, %51 : vector<256x32xf32>
    %53 = vector.shape_cast %52 : vector<256x32xf32> to vector<16x16x32xf32>
    %c0_39 = arith.constant 0 : index
    %c0_40 = arith.constant 0 : index
    %c0_41 = arith.constant 0 : index
    %c0_42 = arith.constant 0 : index
    %54 = vector.load %arg8[%c0_39, %c0_40, %c0_41, %c0_42] : memref<1x16x16x32xf32, #tpu.memory_space<vmem>>, vector<1x16x16x32xf32>
    %55 = vector.shape_cast %54 : vector<1x16x16x32xf32> to vector<16x16x32xf32>
    %56 = vector.shape_cast %53 : vector<16x16x32xf32> to vector<1x16x16x32xf32>
    tpu.vector_store %arg8[%c0_39, %c0_40, %c0_41, %c0_42], %56 {strides = array<i32>} : memref<1x16x16x32xf32, #tpu.memory_space<vmem>>, vector<1x16x16x32xf32>,
    return
  }
  func.func @transform_0(%arg0: i32) -> (i32, i32, i32, i32) {
    %c0_i32 = arith.constant 0 : i32
    %c0_i32_0 = arith.constant 0 : i32
    %c0_i32_1 = arith.constant 0 : i32
    %c0_i32_2 = arith.constant 0 : i32
    return %arg0, %c0_i32, %c0_i32_0, %c0_i32_1 : i32, i32, i32, i32
  }
  func.func @transform_1(%arg0: i32) -> (i32, i32) {
    %c0_i32 = arith.constant 0 : i32
    %c0_i32_0 = arith.constant 0 : i32
    %c0_i32_1 = arith.constant 0 : i32
    return %c0_i32, %c0_i32_0 : i32, i32
  }
  func.func @transform_2(%arg0: i32) -> (i32, i32) {
    %c0_i32 = arith.constant 0 : i32
    %c0_i32_0 = arith.constant 0 : i32
    %c0_i32_1 = arith.constant 0 : i32
    return %c0_i32, %c0_i32_0 : i32, i32
  }
  func.func @transform_3(%arg0: i32) -> (i32, i32, i32) {
    %c0_i32 = arith.constant 0 : i32
    %c0_i32_0 = arith.constant 0 : i32
    %c0_i32_1 = arith.constant 0 : i32
    %c0_i32_2 = arith.constant 0 : i32
    return %c0_i32, %c0_i32_0, %c0_i32_1 : i32, i32, i32
  }
  func.func @transform_4(%arg0: i32) -> (i32, i32) {
    %c0_i32 = arith.constant 0 : i32
    %c0_i32_0 = arith.constant 0 : i32
    %c0_i32_1 = arith.constant 0 : i32
    return %c0_i32, %c0_i32_0 : i32, i32
  }
  func.func @transform_5(%arg0: i32) -> (i32, i32) {
    %c0_i32 = arith.constant 0 : i32
    %c0_i32_0 = arith.constant 0 : i32
    %c0_i32_1 = arith.constant 0 : i32
    return %c0_i32, %c0_i32_0 : i32, i32
  }
  func.func @transform_6(%arg0: i32) -> (i32, i32) {
    %c0_i32 = arith.constant 0 : i32
    %c0_i32_0 = arith.constant 0 : i32
    %c0_i32_1 = arith.constant 0 : i32
    return %c0_i32, %c0_i32_0 : i32, i32
  }
  func.func @transform_7(%arg0: i32) -> (i32, i32, i32, i32) {
    %c0_i32 = arith.constant 0 : i32
    %c0_i32_0 = arith.constant 0 : i32
    %c0_i32_1 = arith.constant 0 : i32
    %c0_i32_2 = arith.constant 0 : i32
    return %arg0, %c0_i32, %c0_i32_0, %c0_i32_1 : i32, i32, i32, i32
  }
}

</mosaic_0001>

<bundles_post_ra>
// kernel: tpu_custom_call.1
= control target key start
LH: loop header
LB: loop body
LE: loop exit
PB: predicated region body
PF: predicated region fallthrough
CT: control target
= control target key end

     0   :  { %12 = vsyncpa [#allocation4], 0  ;;  %s3824_s0 = inlined_call_operand.hbm [shape: f32[2,16,16,32], index: 0, kind: input, shape index: {}]   ;;  %s3825_s1 = inlined_call_operand.vmem [shape: bf16[32,8], index: 1, kind: input, shape index: {}]   ;;  %s3826_s2 = inlined_call_operand.vmem [shape: f32[1,8], index: 2, kind: input, shape index: {}]   ;;  %s3827_s3 = inlined_call_operand.vmem [shape: bf16[3,24,8], index: 3, kind: input, shape index: {}]   ;;  %s3828_s4 = inlined_call_operand.vmem [shape: f32[1,8], index: 4, kind: input, shape index: {}]   ;;  %s3829_s5 = inlined_call_operand.vmem [shape: bf16[8,32], index: 5, kind: input, shape index: {}]   ;;  %s3830_s6 = inlined_call_operand.vmem [shape: f32[1,32], index: 6, kind: input, shape index: {}]   ;;  %s3831_s7 = inlined_call_operand.hbm [shape: f32[2,16,16,32], index: 7, kind: output, shape index: {}]  }
   0x1   :  { %14 = vsyncpa [#allocation4 + $0x1], 0 }
   0x2   :  { %15 = vsyncpa [#allocation5], 0 }
   0x3   :  { %17 = vsyncpa [#allocation5 + $0x1], 0  ;;  %s2930_s24 = smov 0   ;;  %s2932_s25 = smov 0  }
   0x4   :  { %s2934_s26 = smov 0   ;;  %s2936_s27 = smov 0  }
   0x5 LB: > { %s2951_s28 = sadd.s32 4294967295, %s2880_s27   ;;  %s2239_s29 = sadd.s32 4294967294, %s2880_s27   ;;  %s2880_s27 = sphi %s2936_s27, %s3848_s27   ;;  %s2876_s26 = sphi %s2934_s26, %s3847_s26   ;;  %s2872_s25 = sphi %s2932_s25, %s3846_s25   ;;  %s2868_s24 = sphi %s2930_s24, %s3845_s24  }
   0x6   : > { %s2955_s30 = sadd.s32 1, %s2880_s27   ;;  %s30_s8 = sadd.s32 1, %s2876_s26 }
   0x7   : > { %s27_s9 = ssub.s32 %s2880_s27, %s2955_s30  ;;  %p37_p0 = scmp.ne.s32.totalorder %s2876_s26, %s2872_s25 }
   0x8   : > { %p28_p1 = scmp.eq.s32.totalorder %s27_s9, 0  ;;  %p38_p2 = scmp.eq.s32.totalorder %s2880_s27, 0 }
   0x9   : > { %p43_p3 = scmp.ne.s32.totalorder %s2872_s25, %s2868_s24  ;;  %p44_p4 = scmp.eq.s32.totalorder %s2951_s28, 0 }
   0xa   : > { %s2967_s10 = scalar_select %p28_p1, %s2876_s26, %s30_s8  }
   0xb   : > { %p2969_p5 = por %p38_p2, %p37_p0  ;;  %p2973_p6 = por %p44_p4, %p43_p3 }
   0xc   : > { %p193_p7 = scmp.eq.s32.totalorder %s2951_s28, 1  ;;  %p199_p8 = scmp.eq.s32.totalorder %s2239_s29, 1 }
   0xd   : > { %p2704_p10 = scmp.lt.s32.totalorder %s2880_s27, 2  ;;  %s237_s15 = sand.u32 1, %s2876_s26  }
   0xe   : > { %p2980_p11 = por %p193_p7, %p37_p0  ;;  %p2984_p12 = por %p199_p8, %p43_p3 }
   0xf   : > { %s2350_s16 = sshll.u32 %s2880_s27, 12  ;;  %s2242_s17 = sshll.u32 %s237_s15, 8 }
  0x10   : > { %s3835_s13 = scalar_select %p2980_p11, 1, 0 }
  0x11   : > { %s3836_s14 = scalar_select %p2984_p12, 1, 0 }
  0x12   : > { %s2993_s20 = scalar_lea.hbm %s3824_s0, %s2350_s16  ;;  %s241_s21 = scalar_lea.vmem [#allocation3], %s2242_s17 }
  0x13   : > { %s248_s22 = sshll.u32 %s241_s21, 4  ;;  %p2997_p13 = pnand %p2704_p10, %p2969_p5  ;;  %s3001_s22 = int_to_ptr.vmem [resolvable:$true] %s248_s22 }
  0x14   : > { %s3003_s29 = scalar_lea.sflag [#allocation4], %s237_s15  ;;  %s2784_s8 = scalar_lea.hbm %s2993_s20, 4096 }
  0x15   : > { %p2785_p0 = scmp.ne.s32.totalorder %s2993_s20, %s2784_s8  ;;  %p2786_p1 = pneg %p2997_p13 }
  0x16   : > { %s2789_s16 = scalar_lea.hbm %s3824_s0, 8192  ;;  %p2790_p4 = scmp.lt.u32.totalorder %s2993_s20, %s3824_s0 }
  0x17   : > { %p2787_p2 = pnand %p2786_p1, %p2785_p0  ;;  %p2791_p5 = scmp.lt.u32.totalorder %s2789_s16, %s2784_s8 }
  0x18   : > { %p2793_p8 = scmp.lt.u32.totalorder %s2784_s8, %s2993_s20 }
  0x19   : > { %p2788_p3 = pneg %p2787_p2  ;;  %p2792_p7 = por %p2791_p5, %p2790_p4 }
  0x1b   : > { %p2794_p10 = por %p2793_p8, %p2792_p7 }
  0x1d   : > { %p2795_p9 = pnand %p2794_p10, %p2788_p3 }
  0x1f   : > { %2798 = shalt.err (!%p2795_p9)
}
  0x20   : > { %s2799_s15 = scalar_lea.vmem %s3001_s22, 4096  ;;  %s2882_s19 = smov [#allocation3]  }
  0x21   : > { %p2800_p0 = scmp.ne.s32.totalorder %s3001_s22, %s2799_s15  ;;  %s2804_s21 = sshll.u32 %s2882_s19, 4  ;;  %s2805_s21 = int_to_ptr.vmem [resolvable:$false] %s2804_s21 }
  0x22   : > { %s2806_s9 = scalar_lea.vmem %s2805_s21, 8192  ;;  %p2807_p11 = scmp.lt.s32.totalorder %s3001_s22, %s2805_s21 }
  0x23   : > { %p2802_p2 = pnand %p2800_p0, %p2786_p1  ;;  %p2808_p4 = scmp.lt.s32.totalorder %s2806_s9, %s2799_s15 }
  0x25   : > { %p2803_p12 = pneg %p2802_p2  ;;  %p2809_p5 = por %p2808_p4, %p2807_p11 }
  0x27   : > { %p2810_p7 = pnand %p2809_p5, %p2803_p12 }
  0x29   : > { %2813 = shalt.err (!%p2810_p7)
}
  0x2a   : > { %s2883_s8 = smov 128   ;;  %s2884_s11 = smov 8  }
  0x2b   : > { %2699 = dma.hbm_to_vmem [thread:$0]  (!%p2997_p13), %s2993_s20, 4096, %s3001_s22, %s3003_s29, %s2883_s8, %s2883_s8, %s2884_s11  }
  0x2c   : > { %p2245_p9 = scmp.ge.s32.totalorder %s2880_s27, 1  ;;  %p256_p1 = scmp.lt.s32.totalorder %s2880_s27, 3 }
  0x2e   : > { %p257_p3 = pnand %p2245_p9, %p256_p1 }
  0x2f   : > { %s3034_s16 = sand.u32 (!%p257_p3), 1, %s2872_s25  }
  0x30   : > { %260 = sbr.rel (%p257_p3) target bundleno = 1065 (0x429), region = 48  ;;  %s2246_s17 = sshll.u32 (!%p257_p3), %s3034_s16, 8 }
  0x31   : > { %s263_s18 = scalar_lea.sflag (!%p257_p3), [#allocation4], %s3034_s16  ;;  %s3040_s15 = scalar_lea.vmem (!%p257_p3), [#allocation3], %s2246_s17 }
  0x37   : > { %2859 = dma.done.wait (%p2973_p6), %s263_s18, 4096  }
  0x38   : > { %2861 = vsyncadd (%p2973_p6), %s263_s18, 4294963200  ;;  %v2744_v0 = vld [vmem:[%s3825_s1] sm:$0xff]   ;;  %v2745_v1 = vld [vmem:[%s3825_s1 + $0x8] sm:$0xff]   ;;  %vm369_vm0 = vcmask 261120   ;;  %vm822_vm1 = vcmask 1047552   ;;  %s2885_s8 = smov 8  }
  0x39   : > { %2441 = vmatprep.subr.bf16.mxu0 %v2744_v0  ;;  %v298_v2 = vld [vmem:[%s3040_s15] sm:$0xff]  ;;  %v299_v3 = vld [vmem:[%s3040_s15 + $0x8] sm:$0xff]  ;;  %v300_v5 = vld [vmem:[%s3040_s15 + $0x10] sm:$0xff]  ;;  %vm823_vm2 = vsmask.f32 7424  ;;  %vm1135_vm3 = vcmask 1043456  }
  0x3a   : > { %2442 = vmatpush3.bf16.msra.mxu0 %v2744_v0  ;;  %v330_v4 = vpack.c.bf16 %v299_v3, %v298_v2  ;;  %v301_v6 = vld [vmem:[%s3040_s15 + $0x18] sm:$0xff]  ;;  %v302_v7 = vld [vmem:[%s3040_s15 + $0x20] sm:$0xff]  ;;  %v303_v8 = vld [vmem:[%s3040_s15 + $0x28] sm:$0xff]  ;;  %s2886_s20 = smov 16   ;;  %vm1035_vm5 = vcmask 195584   ;;  %vm755_vm6 = vcmask 1040384  }
  0x3b   : > { %2443 = vmatprep.subr.bf16.mxu0 %v2745_v1  ;;  %v331_v9 = vpack.c.bf16 %v301_v6, %v300_v5  ;;  %v332_v10 = vpack.c.bf16 %v303_v8, %v302_v7  ;;  %v304_v11 = vld [vmem:[%s3040_s15 + $0x30] sm:$0xff]  ;;  %v305_v12 = vld [vmem:[%s3040_s15 + $0x38] sm:$0xff]  ;;  %v306_v13 = vld [vmem:[%s3040_s15 + $0x40] sm:$0xff]  ;;  %vm756_vm7 = vsmask.f32 256  ;;  %vm937_vm8 = vcmask 64512  }
  0x3c   : > { %2445 = vmatprep.mubr.msk.bf16.mxu0 %vm369_vm0, %v330_v4  ;;  %v307_v14 = vld [vmem:[%s3040_s15 + $0x48] sm:$0xff]  ;;  %v333_v15 = vpack.c.bf16 %v305_v12, %v304_v11  ;;  %v308_v17 = vld [vmem:[%s3040_s15 + $0x50] sm:$0xff]  ;;  %v309_v18 = vld [vmem:[%s3040_s15 + $0x58] sm:$0xff]  ;;  %vm986_vm10 = vcmask 130048   ;;  %s3650_s19 = scalar_lea.vmem [#allocation6], %s2246_s17  ;;  %s2351_s17 = sshll.u32 %s2951_s28, 12 }
  0x3d   : > { %v334_v16 = vpack.c.bf16 %v307_v14, %v306_v13  ;;  %v310_v19 = vld [vmem:[%s3040_s15 + $0x60] sm:$0xff]  ;;  %v311_v20 = vld [vmem:[%s3040_s15 + $0x68] sm:$0xff]  ;;  %v335_v21 = vpack.c.bf16 %v309_v18, %v308_v17  ;;  %v312_v23 = vld [vmem:[%s3040_s15 + $0x70] sm:$0xff]  ;;  %s2166_s21 = sshll.u32 %s3650_s19, 4  ;;  %s3771_s18 = scalar_lea.hbm %s3831_s7, %s2351_s17  ;;  %s3775_s21 = int_to_ptr.vmem [resolvable:$true] %s2166_s21 }
  0x3e   : > { %2444 = vmatpush3.bf16.msra.mxu0 %v2745_v1  ;;  %v336_v22 = vpack.c.bf16 %v311_v20, %v310_v19  ;;  %v313_v24 = vld [vmem:[%s3040_s15 + $0x78] sm:$0xff]  ;;  %v314_v25 = vld [vmem:[%s3040_s15 + $0x80] sm:$0xff]  ;;  %v315_v26 = vld [vmem:[%s3040_s15 + $0x88] sm:$0xff]  ;;  %s2153_s28 = scalar_lea.sflag [#allocation5], %s3034_s16  ;;  %p3842_p11 = scmp.ne.s32.totalorder %s3835_s13, 0 }
  0x3f   : > { %v337_v27 = vpack.c.bf16 %v313_v24, %v312_v23  ;;  %v338_v28 = vpack.c.bf16 %v315_v26, %v314_v25  ;;  %v316_v29 = vld [vmem:[%s3040_s15 + $0x90] sm:$0xff]  ;;  %v317_v30 = vld [vmem:[%s3040_s15 + $0x98] sm:$0xff]  ;;  %v318_v31 = vld [vmem:[%s3040_s15 + $0xa0] sm:$0xff] }
  0x40   : > { %v319_v32 = vld [vmem:[%s3040_s15 + $0xa8] sm:$0xff]  ;;  %v339_v33 = vpack.c.bf16 %v317_v30, %v316_v29  ;;  %v320_v35 = vld [vmem:[%s3040_s15 + $0xb0] sm:$0xff]  ;;  %v321_v36 = vld [vmem:[%s3040_s15 + $0xb8] sm:$0xff] }
  0x41   : > { %2446 = vmatmul.mubr.msk.bf16.vlgmr.msra.gmra.mrb[0].mxu0 %vm369_vm0, %v331_v9  ;;  %v340_v34 = vpack.c.bf16 %v319_v32, %v318_v31  ;;  %v322_v37 = vld [vmem:[%s3040_s15 + $0xc0] sm:$0xff]  ;;  %v323_v38 = vld [vmem:[%s3040_s15 + $0xc8] sm:$0xff]  ;;  %v341_v39 = vpack.c.bf16 %v321_v36, %v320_v35  ;;  %v324_v41 = vld [vmem:[%s3040_s15 + $0xd0] sm:$0xff] }
  0x42   : > { %2449 = vmatprep.mubr.msk.bf16.mxu0 %vm369_vm0, %v332_v10  ;;  %v342_v40 = vpack.c.bf16 %v323_v38, %v322_v37  ;;  %v325_v42 = vld [vmem:[%s3040_s15 + $0xd8] sm:$0xff]  ;;  %v326_v43 = vld [vmem:[%s3040_s15 + $0xe0] sm:$0xff]  ;;  %v327_v44 = vld [vmem:[%s3040_s15 + $0xe8] sm:$0xff] }
  0x43   : > { %v343_v45 = vpack.c.bf16 %v325_v42, %v324_v41  ;;  %v344_v46 = vpack.c.bf16 %v327_v44, %v326_v43  ;;  %v328_v47 = vld [vmem:[%s3040_s15 + $0xf0] sm:$0xff]  ;;  %v329_v48 = vld [vmem:[%s3040_s15 + $0xf8] sm:$0xff]  ;;  %vm3225_vm4 = vmand %vm822_vm1, %vm823_vm2 }
  0x44   : > { %v345_v49 = vpack.c.bf16 %v329_v48, %v328_v47  ;;  %v3103_v50 = vld [vmem:[%s3826_s2] ss:$0 sm:$0xff]  ;;  %vm3360_vm9 = vmand %vm755_vm6, %vm756_vm7 }
  0x49   : > { %2450 = vmatmul.mubr.msk.bf16.gmra.mrb[4].mxu0 %vm369_vm0, %v333_v15 }
  0x4a   : > { %2453 = vmatprep.mubr.msk.bf16.mxu0 %vm369_vm0, %v334_v16 }
  0x51   : > { %2454 = vmatmul.mubr.msk.bf16.gmra.mrb[8].mxu0 %vm369_vm0, %v335_v21 }
  0x52   : > { %2457 = vmatprep.mubr.msk.bf16.mxu0 %vm369_vm0, %v336_v22 }
  0x59   : > { %2458 = vmatmul.mubr.msk.bf16.gmra.mrb[12].mxu0 %vm369_vm0, %v337_v27 }
  0x5a   : > { %2461 = vmatprep.mubr.msk.bf16.mxu0 %vm369_vm0, %v338_v28 }
  0x61   : > { %2462 = vmatmul.mubr.msk.bf16.gmra.mrb[16].mxu0 %vm369_vm0, %v339_v33 }
  0x62   : > { %2465 = vmatprep.mubr.msk.bf16.mxu0 %vm369_vm0, %v340_v34 }
  0x69   : > { %2466 = vmatmul.mubr.msk.bf16.gmra.mrb[20].mxu0 %vm369_vm0, %v341_v39 }
  0x6a   : > { %2469 = vmatprep.mubr.msk.bf16.mxu0 %vm369_vm0, %v342_v40 }
  0x71   : > { %2470 = vmatmul.mubr.msk.bf16.gmra.mrb[24].mxu0 %vm369_vm0, %v343_v45 }
  0x72   : > { %2473 = vmatprep.mubr.msk.bf16.mxu0 %vm369_vm0, %v344_v46 }
  0x79   : > { %2474 = vmatmul.mubr.msk.bf16.gmra.mrb[28].mxu0 %vm369_vm0, %v345_v49 }
 0x114   : > { %v2447_v51 = vpop.f32.mrb[0].mxu0 }
 0x115   : > { %v461_v52 = vadd.f32 %v2447_v51, %v3103_v50  ;;  %v452_v53 = vpop.f32.mrb[1].mxu0 }
 0x116   : > { %v453_v54 = vadd.f32 %v3103_v50, %v452_v53  ;;  %v2448_v55 = vpop.f32.mrb[2].mxu0 }
 0x117   : > { %v464_v56 = vadd.f32 %v2448_v55, %v3103_v50  ;;  %v455_v57 = vpop.f32.mrb[3].mxu0  ;;  %v581_v59 = vmax.f32 %v461_v52, 0.0 }
 0x118   : > { %v456_v58 = vadd.f32 %v3103_v50, %v455_v57  ;;  %v579_v61 = vmax.f32 %v453_v54, 0.0 }
 0x119   : > { %v582_v60 = vmax.f32 %v464_v56, 0.0 }
 0x11a   : > { %v580_v62 = vmax.f32 %v456_v58, 0.0 }
 0x11b   : > { %v3109_v63 = vpack.c.bf16 %v582_v60, %v581_v59 }
 0x11c   : > { %v3111_v0 = vpack.c.bf16 %v580_v62, %v579_v61  ;;  %v2451_v1 = vpop.f32.mrb[4].mxu0 }
 0x11d   : > { %v477_v2 = vadd.f32 %v2451_v1, %v3103_v50  ;;  %v468_v3 = vpop.f32.mrb[5].mxu0  ;;  %v635_v4 = vshrl.u32 %v3109_v63, 16  ;;  %v638_v8 = vshll.u32 %v3109_v63, 16 }
 0x11e   : > { %v469_v5 = vadd.f32 %v3103_v50, %v468_v3  ;;  %v2452_v6 = vpop.f32.mrb[6].mxu0  ;;  %v628_v7 = vshrl.u32 %v3111_v0, 16  ;;  %v631_v12 = vshll.u32 %v3111_v0, 16 }
 0x11f   : > { %v480_v9 = vadd.f32 %v2452_v6, %v3103_v50  ;;  %v471_v10 = vpop.f32.mrb[7].mxu0  ;;  %v637_v11 = vrot.slane %v635_v4, 7  ;;  %v585_v15 = vmax.f32 %v477_v2, 0.0 }
 0x120   : > { %v472_v13 = vadd.f32 %v3103_v50, %v471_v10  ;;  %v630_v14 = vrot.slane %v628_v7, 7  ;;  %v583_v18 = vmax.f32 %v469_v5, 0.0 }
 0x121   : > { %v586_v16 = vmax.f32 %v480_v9, 0.0  ;;  %v3127_v17 = vor.u32 %v638_v8, %v637_v11 }
 0x122   : > { %v584_v19 = vmax.f32 %v472_v13, 0.0  ;;  %v3131_v20 = vor.u32 %v631_v12, %v630_v14 }
 0x123   : > { %v3133_v21 = vpack.c.bf16 %v586_v16, %v585_v15 }
 0x124   : > { %v3135_v22 = vpack.c.bf16 %v584_v19, %v583_v18  ;;  %v2455_v23 = vpop.f32.mrb[8].mxu0 }
 0x125   : > { %v493_v24 = vadd.f32 %v2455_v23, %v3103_v50  ;;  %v484_v25 = vpop.f32.mrb[9].mxu0  ;;  %v649_v26 = vshrl.u32 %v3133_v21, 16  ;;  %v652_v30 = vshll.u32 %v3133_v21, 16 }
 0x126   : > { %v485_v27 = vadd.f32 %v3103_v50, %v484_v25  ;;  %v2456_v28 = vpop.f32.mrb[10].mxu0  ;;  %v642_v29 = vshrl.u32 %v3135_v22, 16  ;;  %v645_v34 = vshll.u32 %v3135_v22, 16 }
 0x127   : > { %v496_v31 = vadd.f32 %v2456_v28, %v3103_v50  ;;  %v487_v32 = vpop.f32.mrb[11].mxu0  ;;  %v651_v33 = vrot.slane %v649_v26, 7  ;;  %v589_v37 = vmax.f32 %v493_v24, 0.0 }
 0x128   : > { %v488_v35 = vadd.f32 %v3103_v50, %v487_v32  ;;  %v644_v36 = vrot.slane %v642_v29, 7  ;;  %v587_v40 = vmax.f32 %v485_v27, 0.0 }
 0x129   : > { %v590_v38 = vmax.f32 %v496_v31, 0.0  ;;  %v3151_v39 = vor.u32 %v652_v30, %v651_v33 }
 0x12a   : > { %v588_v41 = vmax.f32 %v488_v35, 0.0  ;;  %v3155_v42 = vor.u32 %v645_v34, %v644_v36 }
 0x12b   : > { %v3157_v43 = vpack.c.bf16 %v590_v38, %v589_v37 }
 0x12c   : > { %v3159_v44 = vpack.c.bf16 %v588_v41, %v587_v40  ;;  %v2459_v45 = vpop.f32.mrb[12].mxu0  ;;  %v2746_v40 = vld [vmem:[%s3827_s3 + $0xc] sm:$0xff]  }
 0x12d   : > { %v509_v46 = vadd.f32 %v2459_v45, %v3103_v50  ;;  %v500_v47 = vpop.f32.mrb[13].mxu0  ;;  %v663_v48 = vshrl.u32 %v3157_v43, 16  ;;  %v666_v53 = vshll.u32 %v3157_v43, 16  ;;  %2619 = vmatprep.subr.bf16.mxu1 %v2746_v40  ;;  %2477 = vmatprep.subr.bf16.mxu0 %v2746_v40 }
 0x12e   : > { %v501_v49 = vadd.f32 %v3103_v50, %v500_v47  ;;  %v2460_v51 = vpop.f32.mrb[14].mxu0  ;;  %v656_v52 = vshrl.u32 %v3159_v44, 16  ;;  %v659_v57 = vshll.u32 %v3159_v44, 16  ;;  %2621 = vmatpush3.bf16.msra.mxu1 %v2746_v40  ;;  %2478 = vmatpush3.bf16.msra.mxu0 %v2746_v40 }
 0x12f   : > { %v512_v54 = vadd.f32 %v2460_v51, %v3103_v50  ;;  %v503_v55 = vpop.f32.mrb[15].mxu0  ;;  %v665_v56 = vrot.slane %v663_v48, 7  ;;  %v593_v60 = vmax.f32 %v509_v46, 0.0 }
 0x130   : > { %v504_v58 = vadd.f32 %v3103_v50, %v503_v55  ;;  %v658_v59 = vrot.slane %v656_v52, 7  ;;  %v591_v1 = vmax.f32 %v501_v49, 0.0 }
 0x131   : > { %v594_v61 = vmax.f32 %v512_v54, 0.0  ;;  %v3175_v62 = vor.u32 %v666_v53, %v665_v56 }
 0x132   : > { %v592_v2 = vmax.f32 %v504_v58, 0.0  ;;  %v3179_v3 = vor.u32 %v659_v57, %v658_v59 }
 0x133   : > { %v3181_v5 = vpack.c.bf16 %v594_v61, %v593_v60 }
 0x134   : > { %v3183_v6 = vpack.c.bf16 %v592_v2, %v591_v1  ;;  %v2463_v9 = vpop.f32.mrb[16].mxu0 }
 0x135   : > { %v525_v10 = vadd.f32 %v2463_v9, %v3103_v50  ;;  %v516_v11 = vpop.f32.mrb[17].mxu0  ;;  %v677_v13 = vshrl.u32 %v3181_v5, 16  ;;  %v680_v18 = vshll.u32 %v3181_v5, 16  ;;  %v2747_v9 = vld [vmem:[%s3827_s3 + $0x14] ss:$0 sps:$4 sm:$0xff]  }
 0x136   : > { %v517_v14 = vadd.f32 %v3103_v50, %v516_v11  ;;  %v2464_v15 = vpop.f32.mrb[18].mxu0  ;;  %v670_v16 = vshrl.u32 %v3183_v6, 16  ;;  %v673_v25 = vshll.u32 %v3183_v6, 16  ;;  %2688 = vmatprep.subr.msk.bf16.mxu1 %vm1135_vm3, %v2747_v9  ;;  %2687 = vmatprep.subr.msk.bf16.mxu0 %vm1135_vm3, %v2747_v9 }
 0x137   : > { %v528_v19 = vadd.f32 %v2464_v15, %v3103_v50  ;;  %v519_v23 = vpop.f32.mrb[19].mxu0  ;;  %v679_v24 = vrot.slane %v677_v13, 7  ;;  %v597_v31 = vmax.f32 %v525_v10, 0.0 }
 0x138   : > { %v520_v27 = vadd.f32 %v3103_v50, %v519_v23  ;;  %v672_v28 = vrot.slane %v670_v16, 7  ;;  %v595_v35 = vmax.f32 %v517_v14, 0.0 }
 0x139   : > { %v598_v32 = vmax.f32 %v528_v19, 0.0  ;;  %v3199_v33 = vor.u32 %v680_v18, %v679_v24 }
 0x13a   : > { %v596_v36 = vmax.f32 %v520_v27, 0.0  ;;  %v3203_v37 = vor.u32 %v673_v25, %v672_v28 }
 0x13b   : > { %v620_v38 = vpack.c.bf16 %v598_v32, %v597_v31  ;;  %v1137_v32 = vsel %vm1135_vm3, %v2747_v9, 0 }
 0x13c   : > { %v619_v41 = vpack.c.bf16 %v596_v36, %v595_v35  ;;  %v2467_v45 = vpop.f32.mrb[20].mxu0  ;;  %2622 = vmatpush3.bf16.msra.mxu1 %v1137_v32  ;;  %2480 = vmatpush3.bf16.msra.mxu0 %v1137_v32 }
 0x13d   : > { %v694_v46 = vshll.u32 %v620_v38, 16  ;;  %v541_v47 = vadd.f32 %v2467_v45, %v3103_v50  ;;  %v532_v49 = vpop.f32.mrb[21].mxu0  ;;  %v691_v51 = vshrl.u32 %v620_v38, 16 }
 0x13e   : > { %v533_v54 = vadd.f32 %v3103_v50, %v532_v49  ;;  %v2468_v55 = vpop.f32.mrb[22].mxu0  ;;  %873 = vrot.lane.b32.xlu0 %v619_v41, %s2885_s8  ;;  %v684_v56 = vshrl.u32 %v619_v41, 16  ;;  %v687_v58 = vshll.u32 %v619_v41, 16 }
 0x13f   : > { %v601_v59 = vmax.f32 %v541_v47, 0.0  ;;  %v544_v60 = vadd.f32 %v2468_v55, %v3103_v50  ;;  %v535_v61 = vpop.f32.mrb[23].mxu0  ;;  %v693_v1 = vrot.slane %v691_v51, 7  ;;  %v792_v2 = vrot.slane %v694_v46, 1 }
 0x140   : > { %v599_v10 = vmax.f32 %v533_v54, 0.0  ;;  %v536_v11 = vadd.f32 %v3103_v50, %v535_v61  ;;  %v790_v14 = vrot.slane %v687_v58, 1  ;;  %v686_v15 = vrot.slane %v684_v56, 7 }
 0x141   : > { %v602_v19 = vmax.f32 %v544_v60, 0.0  ;;  %v793_v23 = vor.u32 %v792_v2, %v691_v51  ;;  %v3216_v24 = vor.u32 %v694_v46, %v693_v1  ;;  %v3237_v51 = vld [vmem:[%s3827_s3] sm:$0xff]  }
 0x142   : > { %v600_v27 = vmax.f32 %v536_v11, 0.0  ;;  %875 = vrot.lane.b32.xlu0 %v620_v38, %s2885_s8  ;;  %v791_v28 = vor.u32 %v790_v14, %v684_v56  ;;  %v3219_v31 = vor.u32 %v687_v58, %v686_v15  ;;  %2513 = vmatprep.subr.bf16.mxu1 %v3237_v51 }
 0x143   : > { %v622_v35 = vpack.c.bf16 %v602_v19, %v601_v59  ;;  %v834_v58 = vsel %vm3225_vm4, %v793_v23, 0 }
 0x144   : > { %v621_v40 = vpack.c.bf16 %v600_v27, %v599_v10  ;;  %v2471_v41 = vpop.f32.mrb[24].mxu0  ;;  %v833_v38 = vsel %vm3225_vm4, %v791_v28, 0 }
 0x145   : > { %v708_v45 = vshll.u32 %v622_v35, 16  ;;  %v557_v46 = vadd.f32 %v2471_v41, %v3103_v50  ;;  %v548_v47 = vpop.f32.mrb[25].mxu0  ;;  %921 = vrot.lane.b32.xlu1 %v833_v38, %s2886_s20  ;;  %v705_v49 = vshrl.u32 %v622_v35, 16 }
 0x146   : > { %v701_v54 = vshll.u32 %v621_v40, 16  ;;  %v549_v55 = vadd.f32 %v3103_v50, %v548_v47  ;;  %v2472_v56 = vpop.f32.mrb[26].mxu0  ;;  %877 = vrot.lane.b32.xlu0 %v621_v40, %s2885_s8  ;;  %v698_v59 = vshrl.u32 %v621_v40, 16 }
 0x147   : > { %v605_v60 = vmax.f32 %v557_v46, 0.0  ;;  %v560_v61 = vadd.f32 %v2472_v56, %v3103_v50  ;;  %v551_v1 = vpop.f32.mrb[27].mxu0  ;;  %v707_v2 = vrot.slane %v705_v49, 7  ;;  %v796_v9 = vrot.slane %v708_v45, 1 }
 0x148   : > { %v603_v10 = vmax.f32 %v549_v55, 0.0  ;;  %v552_v11 = vadd.f32 %v3103_v50, %v551_v1  ;;  %v700_v14 = vrot.slane %v698_v59, 7  ;;  %v794_v15 = vrot.slane %v701_v54, 1 }
 0x149   : > { %v606_v19 = vmax.f32 %v560_v61, 0.0  ;;  %923 = vrot.lane.b32.xlu1 %v834_v58, %s2886_s20  ;;  %v3247_v27 = vor.u32 %v708_v45, %v707_v2  ;;  %v797_v32 = vor.u32 %v796_v9, %v705_v49 }
 0x14a   : > { %v604_v23 = vmax.f32 %v552_v11, 0.0  ;;  %v795_v28 = vor.u32 %v794_v15, %v698_v59  ;;  %v3249_v40 = vor.u32 %v701_v54, %v700_v14 }
 0x14b   : > { %v624_v41 = vpack.c.bf16 %v606_v19, %v605_v60  ;;  %v836_v59 = vsel %vm3225_vm4, %v797_v32, 0 }
 0x14c   : > { %v623_v38 = vpack.c.bf16 %v604_v23, %v603_v10  ;;  %v2475_v46 = vpop.f32.mrb[28].mxu0  ;;  %v835_v47 = vsel %vm3225_vm4, %v795_v28, 0 }
 0x14d   : > { %v722_v55 = vshll.u32 %v624_v41, 16  ;;  %v573_v56 = vadd.f32 %v2475_v46, %v3103_v50  ;;  %v564_v1 = vpop.f32.mrb[29].mxu0  ;;  %925 = vrot.lane.b32.xlu0 %v835_v47, %s2886_s20  ;;  %879 = vrot.lane.b32.xlu1 %v622_v35, %s2885_s8  ;;  %v719_v45 = vshrl.u32 %v624_v41, 16 }
 0x14e   : > { %v715_v58 = vshll.u32 %v623_v38, 16  ;;  %v565_v49 = vadd.f32 %v3103_v50, %v564_v1  ;;  %v2476_v54 = vpop.f32.mrb[30].mxu0  ;;  %v712_v60 = vshrl.u32 %v623_v38, 16 }
 0x14f   : > { %v609_v61 = vmax.f32 %v573_v56, 0.0  ;;  %v576_v2 = vadd.f32 %v2476_v54, %v3103_v50  ;;  %v567_v9 = vpop.f32.mrb[31].mxu0  ;;  %v721_v10 = vrot.slane %v719_v45, 7  ;;  %v800_v11 = vrot.slane %v722_v55, 1 }
 0x150   : > { %v607_v14 = vmax.f32 %v565_v49, 0.0  ;;  %v568_v15 = vadd.f32 %v3103_v50, %v567_v9  ;;  %v714_v19 = vrot.slane %v712_v60, 7  ;;  %v798_v35 = vrot.slane %v715_v58, 1 }
 0x151   : > { %v610_v23 = vmax.f32 %v576_v2, 0.0  ;;  %881 = vrot.lane.b32.xlu0 %v623_v38, %s2885_s8  ;;  %927 = vrot.lane.b32.xlu1 %v836_v59, %s2886_s20  ;;  %v3263_v28 = vor.u32 %v722_v55, %v721_v10  ;;  %v801_v54 = vor.u32 %v800_v11, %v719_v45 }
 0x152   : > { %v608_v32 = vmax.f32 %v568_v15, 0.0  ;;  %v799_v46 = vor.u32 %v798_v35, %v712_v60  ;;  %v3265_v47 = vor.u32 %v715_v58, %v714_v19  ;;  %v774_v15 = vrot.slane %v631_v12, 1 }
 0x153   : > { %v626_v56 = vpack.c.bf16 %v610_v23, %v609_v61  ;;  %v838_v60 = vsel %vm3225_vm4, %v801_v54, 0  ;;  %v2887_v19 = vmov 0  }
 0x154   : > { %v625_v1 = vpack.c.bf16 %v608_v32, %v607_v14  ;;  %v837_v49 = vsel %vm3225_vm4, %v799_v46, 0  ;;  %1036 = vst.msk [vmem:[#allocation2] sm:$0xff] %vm1035_vm5, %v2887_v19  ;;  %1037 = vst.msk [vmem:[#allocation2 + $0x88] sm:$0xff] %vm1035_vm5, %v2887_v19  ;;  %v775_v23 = vor.u32 %v774_v15, %v628_v7  ;;  %v776_v32 = vrot.slane %v638_v8, 1 }
 0x155   : > { %v736_v50 = vshll.u32 %v626_v56, 16  ;;  %929 = vrot.lane.b32.xlu0 %v837_v49, %s2886_s20  ;;  %883 = vrot.lane.b32.xlu1 %v624_v41, %s2885_s8  ;;  %v733_v38 = vshrl.u32 %v626_v56, 16  ;;  %v780_v8 = vrot.slane %v652_v30, 1  ;;  %v784_v30 = vrot.slane %v666_v53, 1 }
 0x156   : > { %v729_v2 = vshll.u32 %v625_v1, 16  ;;  %v726_v59 = vshrl.u32 %v625_v1, 16  ;;  %v825_v12 = vsel %vm3225_vm4, %v775_v23, 0  ;;  %v777_v46 = vor.u32 %v776_v32, %v635_v4 }
 0x157   : > { %v735_v55 = vrot.slane %v733_v38, 7  ;;  %v804_v61 = vrot.slane %v736_v50, 1  ;;  %v788_v53 = vrot.slane %v680_v18, 1  ;;  %v767_v49 = vsel %vm3360_vm9, 0, %v3216_v24 }
 0x158   : > { %v728_v58 = vrot.slane %v726_v59, 7  ;;  %v802_v9 = vrot.slane %v729_v2, 1  ;;  %v826_v7 = vsel %vm3225_vm4, %v777_v46, 0  ;;  %v769_v24 = vsel %vm3360_vm9, 0, %v3247_v27 }
 0x159   : > { %885 = vrot.lane.b32.xlu0 %v625_v1, %s2885_s8  ;;  %931 = vrot.lane.b32.xlu1 %v838_v60, %s2886_s20  ;;  %v3275_v45 = vor.u32 %v736_v50, %v735_v55  ;;  %v805_v14 = vor.u32 %v804_v61, %v733_v38  ;;  %v770_v27 = vsel %vm3360_vm9, 0, %v3265_v47 }
 0x15a   : > { %v803_v10 = vor.u32 %v802_v9, %v726_v59  ;;  %v3277_v11 = vor.u32 %v729_v2, %v728_v58 }
 0x15b   : > { %v840_v35 = vsel %vm3225_vm4, %v805_v14, 0 }
 0x15c   : > { %v839_v41 = vsel %vm3225_vm4, %v803_v10, 0 }
 0x15d   : > { %933 = vrot.lane.b32.xlu0 %v839_v41, %s2886_s20  ;;  %887 = vrot.lane.b32.xlu1 %v626_v56, %s2885_s8  ;;  %v778_v56 = vrot.slane %v645_v34, 1  ;;  %v782_v34 = vrot.slane %v659_v57, 1  ;;  %v786_v57 = vrot.slane %v673_v25, 1  ;;  %v2749_v41 = vld [vmem:[%s3827_s3 + $0x8] ss:$0 sps:$4 sm:$0xff]  }
 0x15e   : > { %v1313_v32 = vsel %vm1135_vm3, %v2749_v41, 0 }
 0x161   : > { %935 = vrot.lane.b32.xlu1 %v840_v35, %s2886_s20  ;;  %857 = vrot.lane.b32.xlu0 %v3111_v0, %s2885_s8  ;;  %v779_v0 = vor.u32 %v778_v56, %v642_v29 }
 0x163   : > { %v827_v4 = vsel %vm3225_vm4, %v779_v0, 0 }
 0x165   : > { %859 = vrot.lane.b32.xlu0 %v3109_v63, %s2885_s8  ;;  %905 = vrot.lane.b32.xlu1 %v825_v12, %s2886_s20  ;;  %v781_v63 = vor.u32 %v780_v8, %v649_v26  ;;  %v3409_v12 = vld [vmem:[%s3827_s3 + $0x18] sm:$0xff]  }
 0x167   : > { %v828_v29 = vsel %vm3225_vm4, %v781_v63, 0 }
 0x169   : > { %907 = vrot.lane.b32.xlu0 %v826_v7, %s2886_s20  ;;  %861 = vrot.lane.b32.xlu1 %v3135_v22, %s2885_s8  ;;  %v783_v22 = vor.u32 %v782_v34, %v656_v52 }
 0x16b   : > { %v829_v26 = vsel %vm3225_vm4, %v783_v22, 0 }
 0x16d   : > { %863 = vrot.lane.b32.xlu0 %v3133_v21, %s2885_s8  ;;  %909 = vrot.lane.b32.xlu1 %v827_v4, %s2886_s20  ;;  %v785_v21 = vor.u32 %v784_v30, %v663_v48 }
 0x16f   : > { %v830_v52 = vsel %vm3225_vm4, %v785_v21, 0 }
 0x171   : > { %911 = vrot.lane.b32.xlu0 %v828_v29, %s2886_s20  ;;  %865 = vrot.lane.b32.xlu1 %v3159_v44, %s2885_s8  ;;  %v787_v44 = vor.u32 %v786_v57, %v670_v16 }
 0x173   : > { %v831_v48 = vsel %vm3225_vm4, %v787_v44, 0 }
 0x175   : > { %867 = vrot.lane.b32.xlu0 %v3157_v43, %s2885_s8  ;;  %913 = vrot.lane.b32.xlu1 %v829_v26, %s2886_s20  ;;  %v789_v43 = vor.u32 %v788_v53, %v677_v13  ;;  %v773_v26 = vsel %vm3360_vm9, 0, %v3275_v45  ;;  %v758_v53 = vsel %vm3360_vm9, 0, %v3131_v20 }
 0x177   : > { %v832_v16 = vsel %vm3225_vm4, %v789_v43, 0 }
 0x179   : > { %915 = vrot.lane.b32.xlu0 %v830_v52, %s2886_s20  ;;  %869 = vrot.lane.b32.xlu1 %v3183_v6, %s2885_s8 }
 0x17d   : > { %871 = vrot.lane.b32.xlu0 %v3181_v5, %s2885_s8  ;;  %917 = vrot.lane.b32.xlu1 %v831_v48, %s2886_s20  ;;  %v766_v5 = vsel %vm3360_vm9, 0, %v3219_v31  ;;  %v768_v31 = vsel %vm3360_vm9, 0, %v3249_v40 }
 0x181   : > { %919 = vrot.lane.b32.xlu1 %v832_v16, %s2886_s20  ;;  %s2888_s20 = smov [#allocation6]  }
 0x182   : > { %s2818_s22 = sshll.u32 %s2888_s20, 4  ;;  %s2819_s22 = int_to_ptr.vmem [resolvable:$false] %s2818_s22 }
 0x183   : > { %s2820_s23 = scalar_lea.vmem %s2819_s22, 8192  ;;  %p2821_p8 = scmp.lt.s32.totalorder %s3775_s21, %s2819_s22 }
 0x1b0   : > { %v874_v18 = vpop.permute.xlu0 %873 }
 0x1b1   : > { %v964_v13 = vsel %vm937_vm8, %v766_v5, %v874_v18 }
 0x1b4   : > { %v876_v25 = vpop.permute.xlu0 %875 }
 0x1b5   : > { %v967_v54 = vsel %vm937_vm8, %v767_v49, %v876_v25  ;;  %v759_v25 = vsel %vm3360_vm9, 0, %v3127_v17 }
 0x1b7   : > { %v922_v36 = vpop.permute.xlu1 %921 }
 0x1b8   : > { %v1012_v1 = vsel %vm986_vm10, %v964_v13, %v922_v36  ;;  %v878_v50 = vpop.permute.xlu0 %877  ;;  %v1054_v36 = vld [vmem:[#allocation2] sm:$0xff] }
 0x1b9   : > { %1046 = vst.msk [vmem:[#allocation2 + $0x48] sm:$0xff] %vm1035_vm5, %v1012_v1  ;;  %v970_v59 = vsel %vm937_vm8, %v768_v31, %v878_v50 }
 0x1bb   : > { %v924_v38 = vpop.permute.xlu1 %923 }
 0x1bc   : > { %v1015_v2 = vsel %vm986_vm10, %v967_v54, %v924_v38  ;;  %v760_v54 = vsel %vm3360_vm9, 0, %v3155_v42 }
 0x1bd   : > { %1047 = vst.msk [vmem:[#allocation2 + $0x50] sm:$0xff] %vm1035_vm5, %v1015_v2 }
 0x1bf   : > { %v926_v55 = vpop.permute.xlu0 %925  ;;  %v880_v60 = vpop.permute.xlu1 %879 }
 0x1c0   : > { %v1018_v58 = vsel %vm986_vm10, %v970_v59, %v926_v55  ;;  %v3381_v9 = vld [vmem:[#allocation2 + $0x48] sm:$0xff]  ;;  %v973_v61 = vsel %vm937_vm8, %v769_v24, %v880_v60  ;;  %v761_v59 = vsel %vm3360_vm9, 0, %v3151_v39  ;;  %v762_v39 = vsel %vm3360_vm9, 0, %v3179_v3 }
 0x1c1   : > { %1048 = vst.msk [vmem:[#allocation2 + $0x58] sm:$0xff] %vm1035_vm5, %v1018_v58  ;;  %2497 = vmatprep.mubr.msk.bf16.mxu1 %vm1035_vm5, %v3381_v9  ;;  %v2751_v58 = vld [vmem:[%s3827_s3 + $0x20] ss:$0 sps:$4 sm:$0xff]   ;;  %v763_v3 = vsel %vm3360_vm9, 0, %v3175_v62 }
 0x1c3   : > { %v882_v40 = vpop.permute.xlu0 %881  ;;  %v928_v10 = vpop.permute.xlu1 %927 }
 0x1c4   : > { %v1021_v14 = vsel %vm986_vm10, %v973_v61, %v928_v10  ;;  %v3394_v15 = vld [vmem:[#allocation2 + $0x50] sm:$0xff]  ;;  %v976_v19 = vsel %vm937_vm8, %v770_v27, %v882_v40 }
 0x1c5   : > { %1049 = vst.msk [vmem:[#allocation2 + $0x60] sm:$0xff] %vm1035_vm5, %v1021_v14  ;;  %2498 = vmatmul.mubr.msk.bf16.vlgmr.msra.gmra.mrb[0].mxu1 %vm1035_vm5, %v3394_v15  ;;  %v1554_v14 = vsel %vm1135_vm3, %v2751_v58, 0 }
 0x1c6   : > { %2514 = vmatpush3.bf16.msra.mxu1 %v3237_v51  ;;  %v771_v51 = vsel %vm3360_vm9, 0, %v3263_v28  ;;  %v772_v28 = vsel %vm3360_vm9, 0, %v3277_v11 }
 0x1c7   : > { %v930_v35 = vpop.permute.xlu0 %929  ;;  %v884_v23 = vpop.permute.xlu1 %883  ;;  %2689 = vmatprep.subr.msk.bf16.mxu1 %vm1135_vm3, %v2749_v41 }
 0x1c8   : > { %v1024_v46 = vsel %vm986_vm10, %v976_v19, %v930_v35  ;;  %v3412_v56 = vld [vmem:[#allocation2 + $0x58] sm:$0xff]  ;;  %v979_v47 = vsel %vm937_vm8, %v771_v51, %v884_v23  ;;  %v764_v51 = vsel %vm3360_vm9, 0, %v3203_v37 }
 0x1c9   : > { %1050 = vst.msk [vmem:[#allocation2 + $0x68] sm:$0xff] %vm1035_vm5, %v1024_v46  ;;  %2501 = vmatprep.mubr.msk.bf16.mxu1 %vm1035_vm5, %v3412_v56 }
 0x1ca   : > { %2516 = vmatpush3.bf16.msra.mxu1 %v1313_v32 }
 0x1cb   : > { %v886_v7 = vpop.permute.xlu0 %885  ;;  %v932_v0 = vpop.permute.xlu1 %931  ;;  %2549 = vmatprep.subr.bf16.mxu1 %v3409_v12 }
 0x1cc   : > { %v1027_v8 = vsel %vm986_vm10, %v979_v47, %v932_v0  ;;  %v3423_v4 = vld [vmem:[#allocation2 + $0x60] sm:$0xff]  ;;  %v982_v63 = vsel %vm937_vm8, %v772_v28, %v886_v7  ;;  %v765_v28 = vsel %vm3360_vm9, 0, %v3199_v33 }
 0x1cd   : > { %1051 = vst.msk [vmem:[#allocation2 + $0x70] sm:$0xff] %vm1035_vm5, %v1027_v8  ;;  %2502 = vmatmul.mubr.msk.bf16.gmra.mrb[4].mxu1 %vm1035_vm5, %v3423_v4  ;;  %v1836_v33 = vld [vmem:[%s3829_s5] sm:$0xf] }
 0x1ce   : > { %2691 = vmatprep.subr.msk.bf16.mxu0 %vm1135_vm3, %v1836_v33  ;;  %v1893_v6 = vsel %vm1135_vm3, %v1836_v33, 0 }
 0x1cf   : > { %v934_v34 = vpop.permute.xlu0 %933  ;;  %v888_v29 = vpop.permute.xlu1 %887 }
 0x1d0   : > { %v1030_v22 = vsel %vm986_vm10, %v982_v63, %v934_v34  ;;  %v3433_v30 = vld [vmem:[#allocation2 + $0x68] sm:$0xff]  ;;  %v985_v21 = vsel %vm937_vm8, %v773_v26, %v888_v29 }
 0x1d1   : > { %1052 = vst.msk [vmem:[#allocation2 + $0x78] sm:$0xff] %vm1035_vm5, %v1030_v22  ;;  %2505 = vmatprep.mubr.msk.bf16.mxu1 %vm1035_vm5, %v3433_v30 }
 0x1d3   : > { %v936_v11 = vpop.permute.xlu1 %935  ;;  %v858_v57 = vpop.permute.xlu0 %857 }
 0x1d4   : > { %v1033_v52 = vsel %vm986_vm10, %v985_v21, %v936_v11  ;;  %v3443_v44 = vld [vmem:[#allocation2 + $0x70] sm:$0xff]  ;;  %v940_v48 = vsel %vm937_vm8, %v758_v53, %v858_v57 }
 0x1d5   : > { %1053 = vst.msk [vmem:[#allocation2 + $0x80] sm:$0xff] %vm1035_vm5, %v1033_v52  ;;  %2506 = vmatmul.mubr.msk.bf16.gmra.mrb[8].mxu1 %vm1035_vm5, %v3443_v44 }
 0x1d7   : > { %v860_v45 = vpop.permute.xlu0 %859  ;;  %v906_v43 = vpop.permute.xlu1 %905 }
 0x1d8   : > { %v988_v16 = vsel %vm986_vm10, %v940_v48, %v906_v43  ;;  %v3453_v18 = vld [vmem:[#allocation2 + $0x78] sm:$0xff]  ;;  %v943_v5 = vsel %vm937_vm8, %v759_v25, %v860_v45 }
 0x1d9   : > { %1038 = vst.msk [vmem:[#allocation2 + $0x8] sm:$0xff] %vm1035_vm5, %v988_v16  ;;  %2509 = vmatprep.mubr.msk.bf16.mxu1 %vm1035_vm5, %v3453_v18 }
 0x1db   : > { %v908_v20 = vpop.permute.xlu0 %907  ;;  %v862_v13 = vpop.permute.xlu1 %861 }
 0x1dc   : > { %v991_v1 = vsel %vm986_vm10, %v943_v5, %v908_v20  ;;  %v3463_v49 = vld [vmem:[#allocation2 + $0x80] sm:$0xff]  ;;  %v946_v17 = vsel %vm937_vm8, %v760_v54, %v862_v13 }
 0x1dd   : > { %1039 = vst.msk [vmem:[#allocation2 + $0x10] sm:$0xff] %vm1035_vm5, %v991_v1  ;;  %2510 = vmatmul.mubr.msk.bf16.gmra.mrb[12].mxu1 %vm1035_vm5, %v3463_v49  ;;  %v3581_v20 = vld [vmem:[%s3828_s4] ss:$0 sm:$0xff] }
 0x1de   : > { %2517 = vmatprep.mubr.msk.bf16.mxu1 %vm1035_vm5, %v1054_v36 }
 0x1df   : > { %v864_v50 = vpop.permute.xlu0 %863  ;;  %v910_v38 = vpop.permute.xlu1 %909 }
 0x1e0   : > { %v994_v2 = vsel %vm986_vm10, %v946_v17, %v910_v38  ;;  %v1055_v31 = vld [vmem:[#allocation2 + $0x8] sm:$0xff]  ;;  %v949_v55 = vsel %vm937_vm8, %v761_v59, %v864_v50 }
 0x1e1   : > { %1040 = vst.msk [vmem:[#allocation2 + $0x18] sm:$0xff] %vm1035_vm5, %v994_v2  ;;  %2481 = vmatprep.mubr.msk.bf16.mxu0 %vm1035_vm5, %v1055_v31 }
 0x1e3   : > { %v912_v42 = vpop.permute.xlu0 %911  ;;  %v866_v60 = vpop.permute.xlu1 %865 }
 0x1e4   : > { %v997_v24 = vsel %vm986_vm10, %v949_v55, %v912_v42  ;;  %v1056_v61 = vld [vmem:[#allocation2 + $0x10] sm:$0xff]  ;;  %v952_v40 = vsel %vm937_vm8, %v762_v39, %v866_v60 }
 0x1e5   : > { %1041 = vst.msk [vmem:[#allocation2 + $0x20] sm:$0xff] %vm1035_vm5, %v997_v24  ;;  %2482 = vmatmul.mubr.msk.bf16.vlgmr.msra.gmra.mrb[32].mxu0 %vm1035_vm5, %v1056_v61  ;;  %2518 = vmatmul.mubr.msk.bf16.vlgmr.msra.gmra.mrb[16].mxu1 %vm1035_vm5, %v1055_v31 }
 0x1e6   : > { %2550 = vmatpush3.bf16.msra.mxu1 %v3409_v12  ;;  %2521 = vmatprep.mubr.msk.bf16.mxu1 %vm1035_vm5, %v1056_v61 }
 0x1e7   : > { %v868_v10 = vpop.permute.xlu0 %867  ;;  %v914_v41 = vpop.permute.xlu1 %913  ;;  %2690 = vmatprep.subr.msk.bf16.mxu1 %vm1135_vm3, %v2751_v58  ;;  %2586 = vmatpush3.bf16.msra.mxu0 %v1893_v6 }
 0x1e8   : > { %v1000_v27 = vsel %vm986_vm10, %v952_v40, %v914_v41  ;;  %v1057_v19 = vld [vmem:[#allocation2 + $0x18] sm:$0xff]  ;;  %v955_v35 = vsel %vm937_vm8, %v763_v3, %v868_v10 }
 0x1e9   : > { %1042 = vst.msk [vmem:[#allocation2 + $0x28] sm:$0xff] %vm1035_vm5, %v1000_v27  ;;  %2485 = vmatprep.mubr.msk.bf16.mxu0 %vm1035_vm5, %v1057_v19 }
 0x1ea   : > { %2552 = vmatpush3.bf16.msra.mxu1 %v1554_v14 }
 0x1eb   : > { %v916_v23 = vpop.permute.xlu0 %915  ;;  %v870_v32 = vpop.permute.xlu1 %869 }
 0x1ec   : > { %v1003_v12 = vsel %vm986_vm10, %v955_v35, %v916_v23  ;;  %v1058_v46 = vld [vmem:[#allocation2 + $0x20] sm:$0xff]  ;;  %v958_v62 = vsel %vm937_vm8, %v764_v51, %v870_v32 }
 0x1ed   : > { %1043 = vst.msk [vmem:[#allocation2 + $0x30] sm:$0xff] %vm1035_vm5, %v1003_v12  ;;  %2486 = vmatmul.mubr.msk.bf16.gmra.mrb[36].mxu0 %vm1035_vm5, %v1058_v46  ;;  %2522 = vmatmul.mubr.msk.bf16.gmra.mrb[20].mxu1 %vm1035_vm5, %v1057_v19 }
 0x1ee   : > { %2525 = vmatprep.mubr.msk.bf16.mxu1 %vm1035_vm5, %v1058_v46 }
 0x1ef   : > { %v918_v47 = vpop.permute.xlu1 %917  ;;  %v872_v7 = vpop.permute.xlu0 %871 }
 0x1f0   : > { %v1006_v0 = vsel %vm986_vm10, %v958_v62, %v918_v47  ;;  %v1059_v8 = vld [vmem:[#allocation2 + $0x28] sm:$0xff]  ;;  %v961_v63 = vsel %vm937_vm8, %v765_v28, %v872_v7 }
 0x1f1   : > { %1044 = vst.msk [vmem:[#allocation2 + $0x38] sm:$0xff] %vm1035_vm5, %v1006_v0  ;;  %2489 = vmatprep.mubr.msk.bf16.mxu0 %vm1035_vm5, %v1059_v8 }
 0x1f3   : > { %v920_v37 = vpop.permute.xlu1 %919 }
 0x1f4   : > { %v1009_v34 = vsel %vm986_vm10, %v961_v63, %v920_v37  ;;  %v1060_v29 = vld [vmem:[#allocation2 + $0x30] sm:$0xff] }
 0x1f5   : > { %1045 = vst.msk [vmem:[#allocation2 + $0x40] sm:$0xff] %vm1035_vm5, %v1009_v34  ;;  %2490 = vmatmul.mubr.msk.bf16.gmra.mrb[40].mxu0 %vm1035_vm5, %v1060_v29  ;;  %2526 = vmatmul.mubr.msk.bf16.gmra.mrb[24].mxu1 %vm1035_vm5, %v1059_v8 }
 0x1f6   : > { %2529 = vmatprep.mubr.msk.bf16.mxu1 %vm1035_vm5, %v1060_v29 }
 0x1f8   : > { %v1061_v22 = vld [vmem:[#allocation2 + $0x38] sm:$0xff] }
 0x1f9   : > { %2493 = vmatprep.mubr.msk.bf16.mxu0 %vm1035_vm5, %v1061_v22 }
 0x1fc   : > { %v1062_v26 = vld [vmem:[#allocation2 + $0x40] sm:$0xff] }
 0x1fd   : > { %2494 = vmatmul.mubr.msk.bf16.gmra.mrb[44].mxu0 %vm1035_vm5, %v1062_v26  ;;  %2530 = vmatmul.mubr.msk.bf16.gmra.mrb[28].mxu1 %vm1035_vm5, %v1061_v22 }
 0x1fe   : > { %2533 = vmatprep.mubr.msk.bf16.mxu1 %vm1035_vm5, %v1062_v26 }
 0x205   : > { %2534 = vmatmul.mubr.msk.bf16.gmra.mrb[0].mxu1 %vm1035_vm5, %v3381_v9 }
 0x206   : > { %2537 = vmatprep.mubr.msk.bf16.mxu1 %vm1035_vm5, %v3394_v15 }
 0x20d   : > { %2538 = vmatmul.mubr.msk.bf16.gmra.mrb[4].mxu1 %vm1035_vm5, %v3412_v56 }
 0x20e   : > { %2541 = vmatprep.mubr.msk.bf16.mxu1 %vm1035_vm5, %v3423_v4 }
 0x215   : > { %2542 = vmatmul.mubr.msk.bf16.gmra.mrb[8].mxu1 %vm1035_vm5, %v3433_v30 }
 0x216   : > { %2545 = vmatprep.mubr.msk.bf16.mxu1 %vm1035_vm5, %v3443_v44 }
 0x21d   : > { %2546 = vmatmul.mubr.msk.bf16.gmra.mrb[12].mxu1 %vm1035_vm5, %v3453_v18 }
 0x21e   : > { %2553 = vmatprep.mubr.msk.bf16.mxu1 %vm1035_vm5, %v1056_v61 }
 0x225   : > { %2554 = vmatmul.mubr.msk.bf16.vlgmr.msra.gmra.mrb[16].mxu1 %vm1035_vm5, %v1057_v19 }
 0x226   : > { %2557 = vmatprep.mubr.msk.bf16.mxu1 %vm1035_vm5, %v1058_v46 }
 0x22d   : > { %2558 = vmatmul.mubr.msk.bf16.gmra.mrb[20].mxu1 %vm1035_vm5, %v1059_v8 }
 0x22e   : > { %2561 = vmatprep.mubr.msk.bf16.mxu1 %vm1035_vm5, %v1060_v29 }
 0x235   : > { %2562 = vmatmul.mubr.msk.bf16.gmra.mrb[24].mxu1 %vm1035_vm5, %v1061_v22 }
 0x236   : > { %2565 = vmatprep.mubr.msk.bf16.mxu1 %vm1035_vm5, %v1062_v26 }
 0x23d   : > { %2566 = vmatmul.mubr.msk.bf16.gmra.mrb[28].mxu1 %vm1035_vm5, %v3381_v9  ;;  %v1491_v9 = vld [vmem:[#allocation2 + $0x88] sm:$0xff] }
 0x23e   : > { %2569 = vmatprep.mubr.msk.bf16.mxu1 %vm1035_vm5, %v3394_v15 }
 0x245   : > { %2570 = vmatmul.mubr.msk.bf16.gmra.mrb[0].mxu1 %vm1035_vm5, %v3412_v56 }
 0x246   : > { %2573 = vmatprep.mubr.msk.bf16.mxu1 %vm1035_vm5, %v3423_v4 }
 0x24d   : > { %2574 = vmatmul.mubr.msk.bf16.gmra.mrb[4].mxu1 %vm1035_vm5, %v3433_v30 }
 0x24e   : > { %2577 = vmatprep.mubr.msk.bf16.mxu1 %vm1035_vm5, %v3443_v44 }
 0x255   : > { %2578 = vmatmul.mubr.msk.bf16.gmra.mrb[8].mxu1 %vm1035_vm5, %v3453_v18 }
 0x256   : > { %2581 = vmatprep.mubr.msk.bf16.mxu1 %vm1035_vm5, %v3463_v49 }
 0x25d   : > { %2582 = vmatmul.mubr.msk.bf16.gmra.mrb[12].mxu1 %vm1035_vm5, %v1491_v9 }
 0x2b8   : > { %v2483_v15 = vpop.f32.mrb[32].mxu0 }
 0x2b9   : > { %v1173_v56 = vpop.f32.mrb[33].mxu0 }
 0x2ba   : > { %v2484_v4 = vpop.f32.mrb[34].mxu0 }
 0x2bb   : > { %v1176_v30 = vpop.f32.mrb[35].mxu0 }
 0x2c0   : > { %v2487_v21 = vpop.f32.mrb[36].mxu0 }
 0x2c1   : > { %v1189_v11 = vpop.f32.mrb[37].mxu0 }
 0x2c2   : > { %v2488_v57 = vpop.f32.mrb[38].mxu0 }
 0x2c3   : > { %v1192_v52 = vpop.f32.mrb[39].mxu0 }
 0x2c8   : > { %v2491_v44 = vpop.f32.mrb[40].mxu0 }
 0x2c9   : > { %v1205_v53 = vpop.f32.mrb[41].mxu0 }
 0x2ca   : > { %v2492_v48 = vpop.f32.mrb[42].mxu0 }
 0x2cb   : > { %v1208_v45 = vpop.f32.mrb[43].mxu0 }
 0x2d0   : > { %v3570_v43 = vpop.f32.mrb[44].mxu0 }
 0x2d1   : > { %v3572_v16 = vpop.f32.mrb[45].mxu0 }
 0x2d2   : > { %v3574_v18 = vpop.f32.mrb[46].mxu0 }
 0x2d3   : > { %v3576_v25 = vpop.f32.mrb[47].mxu0 }
 0x2f8   : > { %v2555_v5 = vpop.f32.mrb[16].mxu1 }
 0x2f9   : > { %v2623_v13 = vadd.f32 %v2555_v5, %v2483_v15  ;;  %v1590_v36 = vpop.f32.mrb[17].mxu1 }
 0x2fa   : > { %v2624_v1 = vadd.f32 %v1590_v36, %v1173_v56  ;;  %v2556_v49 = vpop.f32.mrb[18].mxu1 }
 0x2fb   : > { %v1758_v54 = vadd.f32 %v2623_v13, %v3581_v20  ;;  %v2625_v17 = vadd.f32 %v2556_v49, %v2484_v4  ;;  %v1593_v50 = vpop.f32.mrb[19].mxu1 }
 0x2fc   : > { %v1756_v38 = vadd.f32 %v2624_v1, %v3581_v20  ;;  %v2626_v2 = vadd.f32 %v1593_v50, %v1176_v30 }
 0x2fd   : > { %v1759_v31 = vadd.f32 %v2625_v17, %v3581_v20  ;;  %v1790_v55 = vmax.f32 %v1758_v54, 0.0 }
 0x2fe   : > { %v1757_v59 = vadd.f32 %v2626_v2, %v3581_v20  ;;  %v1788_v60 = vmax.f32 %v1756_v38, 0.0 }
 0x2ff   : > { %v1791_v42 = vmax.f32 %v1759_v31, 0.0 }
 0x300   : > { %v1789_v58 = vmax.f32 %v1757_v59, 0.0  ;;  %v2559_v24 = vpop.f32.mrb[20].mxu1 }
 0x301   : > { %v1821_v61 = vpack.c.bf16 %v1791_v42, %v1790_v55  ;;  %v2627_v39 = vadd.f32 %v2559_v24, %v2487_v21  ;;  %v1606_v40 = vpop.f32.mrb[21].mxu1 }
 0x302   : > { %v1820_v10 = vpack.c.bf16 %v1789_v58, %v1788_v60  ;;  %v2628_v41 = vadd.f32 %v1606_v40, %v1189_v11  ;;  %v2560_v14 = vpop.f32.mrb[22].mxu1 }
 0x303   : > { %v1762_v27 = vadd.f32 %v2627_v39, %v3581_v20  ;;  %v2629_v19 = vadd.f32 %v2560_v14, %v2488_v57  ;;  %v1609_v3 = vpop.f32.mrb[23].mxu1 }
 0x304   : > { %v1760_v35 = vadd.f32 %v2628_v41, %v3581_v20  ;;  %v2630_v23 = vadd.f32 %v1609_v3, %v1192_v52  ;;  %2587 = vmatprep.mubr.msk.bf16.mxu0 %vm937_vm8, %v1820_v10 }
 0x305   : > { %v1763_v32 = vadd.f32 %v2629_v19, %v3581_v20  ;;  %2588 = vmatmul.mubr.msk.bf16.vlgmr.msra.gmra.mrb[48].mxu0 %vm937_vm8, %v1821_v61  ;;  %v1794_v46 = vmax.f32 %v1762_v27, 0.0 }
 0x306   : > { %v1761_v12 = vadd.f32 %v2630_v23, %v3581_v20  ;;  %v1792_v62 = vmax.f32 %v1760_v35, 0.0 }
 0x307   : > { %v1795_v51 = vmax.f32 %v1763_v32, 0.0 }
 0x308   : > { %v1793_v47 = vmax.f32 %v1761_v12, 0.0  ;;  %v2563_v7 = vpop.f32.mrb[24].mxu1 }
 0x309   : > { %v1823_v0 = vpack.c.bf16 %v1795_v51, %v1794_v46  ;;  %v2631_v8 = vadd.f32 %v2563_v7, %v2491_v44  ;;  %v1622_v28 = vpop.f32.mrb[25].mxu1 }
 0x30a   : > { %v1822_v63 = vpack.c.bf16 %v1793_v47, %v1792_v62  ;;  %v2632_v37 = vadd.f32 %v1622_v28, %v1205_v53  ;;  %v2564_v34 = vpop.f32.mrb[26].mxu1 }
 0x30b   : > { %v1766_v29 = vadd.f32 %v2631_v8, %v3581_v20  ;;  %v2633_v22 = vadd.f32 %v2564_v34, %v2492_v48  ;;  %v1625_v26 = vpop.f32.mrb[27].mxu1 }
 0x30c   : > { %v1764_v33 = vadd.f32 %v2632_v37, %v3581_v20  ;;  %v2634_v6 = vadd.f32 %v1625_v26, %v1208_v45  ;;  %2591 = vmatprep.mubr.msk.bf16.mxu0 %vm937_vm8, %v1822_v63 }
 0x30d   : > { %v1767_v9 = vadd.f32 %v2633_v22, %v3581_v20  ;;  %2592 = vmatmul.mubr.msk.bf16.gmra.mrb[52].mxu0 %vm937_vm8, %v1823_v0  ;;  %v1798_v56 = vmax.f32 %v1766_v29, 0.0 }
 0x30e   : > { %v1765_v15 = vadd.f32 %v2634_v6, %v3581_v20  ;;  %v1796_v30 = vmax.f32 %v1764_v33, 0.0 }
 0x30f   : > { %v1799_v4 = vmax.f32 %v1767_v9, 0.0 }
 0x310   : > { %v1797_v21 = vmax.f32 %v1765_v15, 0.0  ;;  %v2567_v11 = vpop.f32.mrb[28].mxu1 }
 0x311   : > { %v1825_v57 = vpack.c.bf16 %v1799_v4, %v1798_v56  ;;  %v2635_v52 = vadd.f32 %v2567_v11, %v3570_v43  ;;  %v1638_v44 = vpop.f32.mrb[29].mxu1 }
 0x312   : > { %v1824_v53 = vpack.c.bf16 %v1797_v21, %v1796_v30  ;;  %v2636_v48 = vadd.f32 %v1638_v44, %v3572_v16  ;;  %v2568_v45 = vpop.f32.mrb[30].mxu1 }
 0x313   : > { %v1770_v5 = vadd.f32 %v2635_v52, %v3581_v20  ;;  %v2637_v13 = vadd.f32 %v2568_v45, %v3574_v18  ;;  %v1641_v36 = vpop.f32.mrb[31].mxu1 }
 0x314   : > { %v1768_v1 = vadd.f32 %v2636_v48, %v3581_v20  ;;  %v2638_v49 = vadd.f32 %v1641_v36, %v3576_v25  ;;  %2595 = vmatprep.mubr.msk.bf16.mxu0 %vm937_vm8, %v1824_v53 }
 0x315   : > { %v1771_v54 = vadd.f32 %v2637_v13, %v3581_v20  ;;  %2596 = vmatmul.mubr.msk.bf16.gmra.mrb[56].mxu0 %vm937_vm8, %v1825_v57  ;;  %v1802_v17 = vmax.f32 %v1770_v5, 0.0 }
 0x316   : > { %v1769_v43 = vadd.f32 %v2638_v49, %v3581_v20  ;;  %v1800_v50 = vmax.f32 %v1768_v1, 0.0 }
 0x317   : > { %v1803_v16 = vmax.f32 %v1771_v54, 0.0 }
 0x318   : > { %v1801_v38 = vmax.f32 %v1769_v43, 0.0  ;;  %v2571_v2 = vpop.f32.mrb[0].mxu1  ;;  %v3638_v43 = vld [vmem:[%s3830_s6] ss:$0 sm:$0xff] }
 0x319   : > { %v1827_v31 = vpack.c.bf16 %v1803_v16, %v1802_v17  ;;  %v1774_v18 = vadd.f32 %v2571_v2, %v3581_v20  ;;  %v1654_v59 = vpop.f32.mrb[1].mxu1  ;;  %v2752_v2 = vld [vmem:[%s3040_s15 + $0x10] sm:$0xff] }
 0x31a   : > { %v1826_v55 = vpack.c.bf16 %v1801_v38, %v1800_v50  ;;  %v1772_v25 = vadd.f32 %v3581_v20, %v1654_v59  ;;  %v2572_v42 = vpop.f32.mrb[2].mxu1 }
 0x31b   : > { %v1775_v60 = vadd.f32 %v2572_v42, %v3581_v20  ;;  %v1657_v58 = vpop.f32.mrb[3].mxu1  ;;  %v1806_v61 = vmax.f32 %v1774_v18, 0.0 }
 0x31c   : > { %v1773_v24 = vadd.f32 %v3581_v20, %v1657_v58  ;;  %2599 = vmatprep.mubr.msk.bf16.mxu0 %vm937_vm8, %v1826_v55  ;;  %v1804_v40 = vmax.f32 %v1772_v25, 0.0  ;;  %v2753_v55 = vld [vmem:[%s3040_s15] sm:$0xff]  ;;  %v2754_v58 = vld [vmem:[%s3040_s15 + $0x18] sm:$0xff] }
 0x31d   : > { %v1807_v39 = vmax.f32 %v1775_v60, 0.0  ;;  %2600 = vmatmul.mubr.msk.bf16.gmra.mrb[60].mxu0 %vm937_vm8, %v1827_v31 }
 0x31e   : > { %v1805_v10 = vmax.f32 %v1773_v24, 0.0 }
 0x31f   : > { %v1829_v41 = vpack.c.bf16 %v1807_v39, %v1806_v61  ;;  %v2755_v39 = vld [vmem:[%s3040_s15 + $0x8] sm:$0xff] }
 0x320   : > { %v1828_v14 = vpack.c.bf16 %v1805_v10, %v1804_v40  ;;  %v2575_v27 = vpop.f32.mrb[4].mxu1 }
 0x321   : > { %v1778_v19 = vadd.f32 %v2575_v27, %v3581_v20  ;;  %v1670_v3 = vpop.f32.mrb[5].mxu1 }
 0x322   : > { %v1776_v35 = vadd.f32 %v3581_v20, %v1670_v3  ;;  %v2576_v23 = vpop.f32.mrb[6].mxu1  ;;  %2603 = vmatprep.mubr.msk.bf16.mxu0 %vm937_vm8, %v1828_v14 }
 0x323   : > { %v1779_v32 = vadd.f32 %v2576_v23, %v3581_v20  ;;  %v1673_v12 = vpop.f32.mrb[7].mxu1  ;;  %v1810_v51 = vmax.f32 %v1778_v19, 0.0  ;;  %v2756_v23 = vld [vmem:[%s3040_s15 + $0x30] sm:$0xff] }
 0x324   : > { %v1777_v46 = vadd.f32 %v3581_v20, %v1673_v12  ;;  %v1808_v47 = vmax.f32 %v1776_v35, 0.0 }
 0x325   : > { %v1811_v62 = vmax.f32 %v1779_v32, 0.0  ;;  %2604 = vmatmul.mubr.msk.bf16.gmra.mrb[64].mxu0 %vm937_vm8, %v1829_v41 }
 0x326   : > { %v1809_v7 = vmax.f32 %v1777_v46, 0.0 }
 0x327   : > { %v1831_v0 = vpack.c.bf16 %v1811_v62, %v1810_v51  ;;  %v2757_v51 = vld [vmem:[%s3040_s15 + $0x20] sm:$0xff] }
 0x328   : > { %v1830_v8 = vpack.c.bf16 %v1809_v7, %v1808_v47  ;;  %v2579_v28 = vpop.f32.mrb[8].mxu1 }
 0x329   : > { %v1782_v63 = vadd.f32 %v2579_v28, %v3581_v20  ;;  %v1686_v37 = vpop.f32.mrb[9].mxu1 }
 0x32a   : > { %v1780_v34 = vadd.f32 %v3581_v20, %v1686_v37  ;;  %v2580_v29 = vpop.f32.mrb[10].mxu1  ;;  %2607 = vmatprep.mubr.msk.bf16.mxu0 %vm937_vm8, %v1830_v8 }
 0x32b   : > { %v1783_v22 = vadd.f32 %v2580_v29, %v3581_v20  ;;  %v1689_v26 = vpop.f32.mrb[11].mxu1  ;;  %v1814_v6 = vmax.f32 %v1782_v63, 0.0  ;;  %v2759_v63 = vld [vmem:[%s3040_s15 + $0x28] sm:$0xff] }
 0x32c   : > { %v1781_v33 = vadd.f32 %v3581_v20, %v1689_v26  ;;  %v1812_v15 = vmax.f32 %v1780_v34, 0.0 }
 0x32d   : > { %v1815_v9 = vmax.f32 %v1783_v22, 0.0  ;;  %2608 = vmatmul.mubr.msk.bf16.gmra.mrb[68].mxu0 %vm937_vm8, %v1831_v0  ;;  %v2758_v0 = vld [vmem:[%s3040_s15 + $0x38] sm:$0xff] }
 0x32e   : > { %v1813_v56 = vmax.f32 %v1781_v33, 0.0 }
 0x32f   : > { %v1833_v4 = vpack.c.bf16 %v1815_v9, %v1814_v6 }
 0x330   : > { %v1832_v30 = vpack.c.bf16 %v1813_v56, %v1812_v15  ;;  %v2583_v21 = vpop.f32.mrb[12].mxu1  ;;  %v2760_v15 = vld [vmem:[%s3040_s15 + $0x50] sm:$0xff] }
 0x331   : > { %v1786_v11 = vadd.f32 %v2583_v21, %v3581_v20  ;;  %v1702_v57 = vpop.f32.mrb[13].mxu1  ;;  %v2761_v21 = vld [vmem:[%s3040_s15 + $0x40] sm:$0xff] }
 0x332   : > { %v1784_v52 = vadd.f32 %v3581_v20, %v1702_v57  ;;  %v2584_v44 = vpop.f32.mrb[14].mxu1  ;;  %2611 = vmatprep.mubr.msk.bf16.mxu0 %vm937_vm8, %v1832_v30 }
 0x333   : > { %v1787_v53 = vadd.f32 %v2584_v44, %v3581_v20  ;;  %v1705_v48 = vpop.f32.mrb[15].mxu1  ;;  %v1818_v5 = vmax.f32 %v1786_v11, 0.0  ;;  %v2762_v44 = vld [vmem:[%s3040_s15 + $0x58] sm:$0xff] }
 0x334   : > { %v1785_v45 = vadd.f32 %v3581_v20, %v1705_v48  ;;  %v1816_v36 = vmax.f32 %v1784_v52, 0.0 }
 0x335   : > { %v1819_v13 = vmax.f32 %v1787_v53, 0.0  ;;  %2612 = vmatmul.mubr.msk.bf16.gmra.mrb[72].mxu0 %vm937_vm8, %v1833_v4 }
 0x336   : > { %v1817_v1 = vmax.f32 %v1785_v45, 0.0  ;;  %v2763_v45 = vld [vmem:[%s3040_s15 + $0x48] sm:$0xff] }
 0x337   : > { %v1835_v49 = vpack.c.bf16 %v1819_v13, %v1818_v5 }
 0x338   : > { %v1834_v54 = vpack.c.bf16 %v1817_v1, %v1816_v36 }
 0x33a   : > { %2615 = vmatprep.mubr.msk.bf16.mxu0 %vm937_vm8, %v1834_v54 }
 0x33d   : > { %2616 = vmatmul.mubr.msk.bf16.gmra.mrb[76].mxu0 %vm937_vm8, %v1835_v49 }
 0x3d8   : > { %v2589_v20 = vpop.f32.mrb[48].mxu0 }
 0x3d9   : > { %v1938_v17 = vadd.f32 %v2589_v20, %v3638_v43  ;;  %v1929_v16 = vpop.f32.mrb[49].mxu0 }
 0x3da   : > { %v1930_v50 = vadd.f32 %v3638_v43, %v1929_v16  ;;  %v2590_v38 = vpop.f32.mrb[50].mxu0  ;;  %v2764_v16 = vld [vmem:[%s3040_s15 + $0x70] sm:$0xff] }
 0x3db   : > { %v2058_v31 = vadd.f32 %v2752_v2, %v1938_v17  ;;  %v1941_v18 = vadd.f32 %v2590_v38, %v3638_v43  ;;  %v1932_v59 = vpop.f32.mrb[51].mxu0 }
 0x3dc   : > { %v2056_v25 = vadd.f32 %v2753_v55, %v1930_v50  ;;  %v1933_v42 = vadd.f32 %v3638_v43, %v1932_v59 }
 0x3dd   : > { %v2090_v60 = vmax.f32 %v2058_v31, 0.0  ;;  %v2059_v24 = vadd.f32 %v2754_v58, %v1941_v18  ;;  %v2765_v31 = vld [vmem:[%s3040_s15 + $0x60] sm:$0xff]  ;;  %v2767_v58 = vld [vmem:[%s3040_s15 + $0x68] sm:$0xff] }
 0x3de   : > { %v2088_v61 = vmax.f32 %v2056_v25, 0.0  ;;  %v2057_v40 = vadd.f32 %v2755_v39, %v1933_v42  ;;  %v2766_v25 = vld [vmem:[%s3040_s15 + $0x78] sm:$0xff] }
 0x3df   : > { %2122 = vst.msk [vmem:[%s3650_s19 + $0x10] sm:$0xff] %vm369_vm0, %v2090_v60  ;;  %v2091_v10 = vmax.f32 %v2059_v24, 0.0 }
 0x3e0   : > { %2120 = vst.msk [vmem:[%s3650_s19] sm:$0xff] %vm369_vm0, %v2088_v61  ;;  %v2089_v41 = vmax.f32 %v2057_v40, 0.0  ;;  %v2593_v14 = vpop.f32.mrb[52].mxu0 }
 0x3e1   : > { %2123 = vst.msk [vmem:[%s3650_s19 + $0x18] sm:$0xff] %vm369_vm0, %v2091_v10  ;;  %v1954_v27 = vadd.f32 %v2593_v14, %v3638_v43  ;;  %v1945_v19 = vpop.f32.mrb[53].mxu0 }
 0x3e2   : > { %2121 = vst.msk [vmem:[%s3650_s19 + $0x8] sm:$0xff] %vm369_vm0, %v2089_v41  ;;  %v1946_v3 = vadd.f32 %v3638_v43, %v1945_v19  ;;  %v2594_v35 = vpop.f32.mrb[54].mxu0  ;;  %v2768_v19 = vld [vmem:[%s3040_s15 + $0x90] sm:$0xff] }
 0x3e3   : > { %v2062_v32 = vadd.f32 %v2756_v23, %v1954_v27  ;;  %v1957_v12 = vadd.f32 %v2594_v35, %v3638_v43  ;;  %v1948_v46 = vpop.f32.mrb[55].mxu0 }
 0x3e4   : > { %v2060_v62 = vadd.f32 %v2757_v51, %v1946_v3  ;;  %v1949_v47 = vadd.f32 %v3638_v43, %v1948_v46 }
 0x3e5   : > { %v2094_v7 = vmax.f32 %v2062_v32, 0.0  ;;  %v2063_v8 = vadd.f32 %v2758_v0, %v1957_v12  ;;  %v2769_v32 = vld [vmem:[%s3040_s15 + $0x80] sm:$0xff]  ;;  %v2771_v0 = vld [vmem:[%s3040_s15 + $0x88] sm:$0xff] }
 0x3e6   : > { %v2092_v28 = vmax.f32 %v2060_v62, 0.0  ;;  %v2061_v37 = vadd.f32 %v2759_v63, %v1949_v47  ;;  %v2770_v62 = vld [vmem:[%s3040_s15 + $0x98] sm:$0xff] }
 0x3e7   : > { %2126 = vst.msk [vmem:[%s3650_s19 + $0x30] sm:$0xff] %vm369_vm0, %v2094_v7  ;;  %v2095_v34 = vmax.f32 %v2063_v8, 0.0 }
 0x3e8   : > { %2124 = vst.msk [vmem:[%s3650_s19 + $0x20] sm:$0xff] %vm369_vm0, %v2092_v28  ;;  %v2093_v29 = vmax.f32 %v2061_v37, 0.0  ;;  %v2597_v22 = vpop.f32.mrb[56].mxu0 }
 0x3e9   : > { %2127 = vst.msk [vmem:[%s3650_s19 + $0x38] sm:$0xff] %vm369_vm0, %v2095_v34  ;;  %v1970_v26 = vadd.f32 %v2597_v22, %v3638_v43  ;;  %v1961_v33 = vpop.f32.mrb[57].mxu0 }
 0x3ea   : > { %2125 = vst.msk [vmem:[%s3650_s19 + $0x28] sm:$0xff] %vm369_vm0, %v2093_v29  ;;  %v1962_v6 = vadd.f32 %v3638_v43, %v1961_v33  ;;  %v2598_v9 = vpop.f32.mrb[58].mxu0  ;;  %v2772_v33 = vld [vmem:[%s3040_s15 + $0xb0] sm:$0xff] }
 0x3eb   : > { %v2066_v56 = vadd.f32 %v2760_v15, %v1970_v26  ;;  %v1973_v4 = vadd.f32 %v2598_v9, %v3638_v43  ;;  %v1964_v30 = vpop.f32.mrb[59].mxu0 }
 0x3ec   : > { %v2064_v11 = vadd.f32 %v2761_v21, %v1962_v6  ;;  %v1965_v57 = vadd.f32 %v3638_v43, %v1964_v30 }
 0x3ed   : > { %v2098_v52 = vmax.f32 %v2066_v56, 0.0  ;;  %v2067_v53 = vadd.f32 %v2762_v44, %v1973_v4  ;;  %v2773_v56 = vld [vmem:[%s3040_s15 + $0xa0] sm:$0xff]  ;;  %v2775_v44 = vld [vmem:[%s3040_s15 + $0xa8] sm:$0xff] }
 0x3ee   : > { %v2096_v48 = vmax.f32 %v2064_v11, 0.0  ;;  %v2065_v5 = vadd.f32 %v2763_v45, %v1965_v57  ;;  %v2774_v11 = vld [vmem:[%s3040_s15 + $0xb8] sm:$0xff] }
 0x3ef   : > { %2130 = vst.msk [vmem:[%s3650_s19 + $0x50] sm:$0xff] %vm369_vm0, %v2098_v52  ;;  %v2099_v13 = vmax.f32 %v2067_v53, 0.0 }
 0x3f0   : > { %2128 = vst.msk [vmem:[%s3650_s19 + $0x40] sm:$0xff] %vm369_vm0, %v2096_v48  ;;  %v2097_v36 = vmax.f32 %v2065_v5, 0.0  ;;  %v2601_v1 = vpop.f32.mrb[60].mxu0 }
 0x3f1   : > { %2131 = vst.msk [vmem:[%s3650_s19 + $0x58] sm:$0xff] %vm369_vm0, %v2099_v13  ;;  %v1986_v49 = vadd.f32 %v2601_v1, %v3638_v43  ;;  %v1977_v54 = vpop.f32.mrb[61].mxu0 }
 0x3f2   : > { %2129 = vst.msk [vmem:[%s3650_s19 + $0x48] sm:$0xff] %vm369_vm0, %v2097_v36  ;;  %v1978_v20 = vadd.f32 %v3638_v43, %v1977_v54  ;;  %v2602_v17 = vpop.f32.mrb[62].mxu0  ;;  %v2776_v54 = vld [vmem:[%s3040_s15 + $0xd0] sm:$0xff] }
 0x3f3   : > { %v2070_v50 = vadd.f32 %v2764_v16, %v1986_v49  ;;  %v1989_v38 = vadd.f32 %v2602_v17, %v3638_v43  ;;  %v1980_v2 = vpop.f32.mrb[63].mxu0 }
 0x3f4   : > { %v2068_v18 = vadd.f32 %v2765_v31, %v1978_v20  ;;  %v1981_v59 = vadd.f32 %v3638_v43, %v1980_v2 }
 0x3f5   : > { %v2102_v55 = vmax.f32 %v2070_v50, 0.0  ;;  %v2071_v42 = vadd.f32 %v2766_v25, %v1989_v38  ;;  %v2777_v50 = vld [vmem:[%s3040_s15 + $0xc0] sm:$0xff]  ;;  %v2779_v25 = vld [vmem:[%s3040_s15 + $0xc8] sm:$0xff] }
 0x3f6   : > { %v2100_v60 = vmax.f32 %v2068_v18, 0.0  ;;  %v2069_v24 = vadd.f32 %v2767_v58, %v1981_v59  ;;  %v2778_v18 = vld [vmem:[%s3040_s15 + $0xd8] sm:$0xff] }
 0x3f7   : > { %2134 = vst.msk [vmem:[%s3650_s19 + $0x70] sm:$0xff] %vm369_vm0, %v2102_v55  ;;  %v2103_v61 = vmax.f32 %v2071_v42, 0.0 }
 0x3f8   : > { %2132 = vst.msk [vmem:[%s3650_s19 + $0x60] sm:$0xff] %vm369_vm0, %v2100_v60  ;;  %v2101_v39 = vmax.f32 %v2069_v24, 0.0  ;;  %v2605_v40 = vpop.f32.mrb[64].mxu0 }
 0x3f9   : > { %2135 = vst.msk [vmem:[%s3650_s19 + $0x78] sm:$0xff] %vm369_vm0, %v2103_v61  ;;  %v2002_v10 = vadd.f32 %v2605_v40, %v3638_v43  ;;  %v1993_v41 = vpop.f32.mrb[65].mxu0 }
 0x3fa   : > { %2133 = vst.msk [vmem:[%s3650_s19 + $0x68] sm:$0xff] %vm369_vm0, %v2101_v39  ;;  %v1994_v14 = vadd.f32 %v3638_v43, %v1993_v41  ;;  %v2606_v27 = vpop.f32.mrb[66].mxu0  ;;  %v2780_v41 = vld [vmem:[%s3040_s15 + $0xf0] sm:$0xff] }
 0x3fb   : > { %v2074_v3 = vadd.f32 %v2768_v19, %v2002_v10  ;;  %v2005_v35 = vadd.f32 %v2606_v27, %v3638_v43  ;;  %v1996_v23 = vpop.f32.mrb[67].mxu0 }
 0x3fc   : > { %v2072_v12 = vadd.f32 %v2769_v32, %v1994_v14  ;;  %v1997_v46 = vadd.f32 %v3638_v43, %v1996_v23 }
 0x3fd   : > { %v2106_v51 = vmax.f32 %v2074_v3, 0.0  ;;  %v2075_v47 = vadd.f32 %v2770_v62, %v2005_v35  ;;  %v2781_v3 = vld [vmem:[%s3040_s15 + $0xe0] sm:$0xff]  ;;  %v2783_v62 = vld [vmem:[%s3040_s15 + $0xe8] sm:$0xff] }
 0x3fe   : > { %v2104_v7 = vmax.f32 %v2072_v12, 0.0  ;;  %v2073_v8 = vadd.f32 %v2771_v0, %v1997_v46  ;;  %v2782_v12 = vld [vmem:[%s3040_s15 + $0xf8] sm:$0xff]  ;;  %s2814_s15 = scalar_lea.vmem %s3775_s21, 4096 }
 0x3ff   : > { %2138 = vst.msk [vmem:[%s3650_s19 + $0x90] sm:$0xff] %vm369_vm0, %v2106_v51  ;;  %v2107_v28 = vmax.f32 %v2075_v47, 0.0  ;;  %p2815_p6 = scmp.ne.s32.totalorder %s3775_s21, %s2814_s15  ;;  %p2822_p10 = scmp.lt.s32.totalorder %s2820_s23, %s2814_s15 }
 0x400   : > { %2136 = vst.msk [vmem:[%s3650_s19 + $0x80] sm:$0xff] %vm369_vm0, %v2104_v7  ;;  %v2105_v63 = vmax.f32 %v2073_v8, 0.0  ;;  %v2609_v37 = vpop.f32.mrb[68].mxu0 }
 0x401   : > { %2139 = vst.msk [vmem:[%s3650_s19 + $0x98] sm:$0xff] %vm369_vm0, %v2107_v28  ;;  %v2018_v34 = vadd.f32 %v2609_v37, %v3638_v43  ;;  %v2009_v29 = vpop.f32.mrb[69].mxu0  ;;  %p2816_p12 = pnand %p2815_p6, %p3842_p11  ;;  %p2823_p0 = por %p2822_p10, %p2821_p8 }
 0x402   : > { %2137 = vst.msk [vmem:[%s3650_s19 + $0x88] sm:$0xff] %vm369_vm0, %v2105_v63  ;;  %v2010_v22 = vadd.f32 %v3638_v43, %v2009_v29  ;;  %v2610_v26 = vpop.f32.mrb[70].mxu0 }
 0x403   : > { %v2078_v6 = vadd.f32 %v2772_v33, %v2018_v34  ;;  %v2021_v9 = vadd.f32 %v2610_v26, %v3638_v43  ;;  %v2012_v15 = vpop.f32.mrb[71].mxu0  ;;  %p2817_p13 = pneg %p2816_p12 }
 0x404   : > { %v2076_v4 = vadd.f32 %v2773_v56, %v2010_v22  ;;  %v2013_v30 = vadd.f32 %v3638_v43, %v2012_v15 }
 0x405   : > { %v2110_v21 = vmax.f32 %v2078_v6, 0.0  ;;  %v2079_v57 = vadd.f32 %v2774_v11, %v2021_v9  ;;  %p2824_p2 = pnand %p2823_p0, %p2817_p13 }
 0x406   : > { %v2108_v52 = vmax.f32 %v2076_v4, 0.0  ;;  %v2077_v53 = vadd.f32 %v2775_v44, %v2013_v30 }
 0x407   : > { %2142 = vst.msk [vmem:[%s3650_s19 + $0xb0] sm:$0xff] %vm369_vm0, %v2110_v21  ;;  %v2111_v48 = vmax.f32 %v2079_v57, 0.0 }
 0x408   : > { %2140 = vst.msk [vmem:[%s3650_s19 + $0xa0] sm:$0xff] %vm369_vm0, %v2108_v52  ;;  %v2109_v45 = vmax.f32 %v2077_v53, 0.0  ;;  %v2613_v5 = vpop.f32.mrb[72].mxu0 }
 0x409   : > { %2143 = vst.msk [vmem:[%s3650_s19 + $0xb8] sm:$0xff] %vm369_vm0, %v2111_v48  ;;  %v2034_v13 = vadd.f32 %v2613_v5, %v3638_v43  ;;  %v2025_v36 = vpop.f32.mrb[73].mxu0 }
 0x40a   : > { %2141 = vst.msk [vmem:[%s3650_s19 + $0xa8] sm:$0xff] %vm369_vm0, %v2109_v45  ;;  %v2026_v1 = vadd.f32 %v3638_v43, %v2025_v36  ;;  %v2614_v49 = vpop.f32.mrb[74].mxu0 }
 0x40b   : > { %v2082_v20 = vadd.f32 %v2776_v54, %v2034_v13  ;;  %v2037_v17 = vadd.f32 %v2614_v49, %v3638_v43  ;;  %v2028_v16 = vpop.f32.mrb[75].mxu0 }
 0x40c   : > { %v2080_v38 = vadd.f32 %v2777_v50, %v2026_v1  ;;  %v2029_v2 = vadd.f32 %v3638_v43, %v2028_v16 }
 0x40d   : > { %v2114_v31 = vmax.f32 %v2082_v20, 0.0  ;;  %v2083_v59 = vadd.f32 %v2778_v18, %v2037_v17 }
 0x40e   : > { %v2112_v55 = vmax.f32 %v2080_v38, 0.0  ;;  %v2081_v42 = vadd.f32 %v2779_v25, %v2029_v2 }
 0x40f   : > { %2146 = vst.msk [vmem:[%s3650_s19 + $0xd0] sm:$0xff] %vm369_vm0, %v2114_v31  ;;  %v2115_v60 = vmax.f32 %v2083_v59, 0.0 }
 0x410   : > { %2144 = vst.msk [vmem:[%s3650_s19 + $0xc0] sm:$0xff] %vm369_vm0, %v2112_v55  ;;  %v2113_v58 = vmax.f32 %v2081_v42, 0.0  ;;  %v2617_v24 = vpop.f32.mrb[76].mxu0 }
 0x411   : > { %2147 = vst.msk [vmem:[%s3650_s19 + $0xd8] sm:$0xff] %vm369_vm0, %v2115_v60  ;;  %v2050_v61 = vadd.f32 %v2617_v24, %v3638_v43  ;;  %v2041_v39 = vpop.f32.mrb[77].mxu0 }
 0x412   : > { %2145 = vst.msk [vmem:[%s3650_s19 + $0xc8] sm:$0xff] %vm369_vm0, %v2113_v58  ;;  %v2042_v40 = vadd.f32 %v3638_v43, %v2041_v39  ;;  %v2618_v10 = vpop.f32.mrb[78].mxu0 }
 0x413   : > { %v2086_v14 = vadd.f32 %v2780_v41, %v2050_v61  ;;  %v2053_v27 = vadd.f32 %v2618_v10, %v3638_v43  ;;  %v2044_v19 = vpop.f32.mrb[79].mxu0 }
 0x414   : > { %v2084_v35 = vadd.f32 %v2781_v3, %v2042_v40  ;;  %v2045_v23 = vadd.f32 %v3638_v43, %v2044_v19 }
 0x415   : > { %v2118_v32 = vmax.f32 %v2086_v14, 0.0  ;;  %v2087_v46 = vadd.f32 %v2782_v12, %v2053_v27 }
 0x416   : > { %v2116_v51 = vmax.f32 %v2084_v35, 0.0  ;;  %v2085_v47 = vadd.f32 %v2783_v62, %v2045_v23 }
 0x417   : > { %2150 = vst.msk [vmem:[%s3650_s19 + $0xf0] sm:$0xff] %vm369_vm0, %v2118_v32  ;;  %v2119_v7 = vmax.f32 %v2087_v46, 0.0 }
 0x418   : > { %2148 = vst.msk [vmem:[%s3650_s19 + $0xe0] sm:$0xff] %vm369_vm0, %v2116_v51  ;;  %v2117_v43 = vmax.f32 %v2085_v47, 0.0 }
 0x419   : > { %2151 = vst.msk [vmem:[%s3650_s19 + $0xf8] sm:$0xff] %vm369_vm0, %v2119_v7 }
 0x41a   : > { %2149 = vst.msk [vmem:[%s3650_s19 + $0xe8] sm:$0xff] %vm369_vm0, %v2117_v43 }
 0x41b   : > { %2827 = shalt.err (!%p2824_p2)
}
 0x41c   : > { %s2828_s29 = scalar_lea.hbm %s3771_s18, 4096  ;;  %s2832_s17 = scalar_lea.hbm %s3831_s7, 8192 }
 0x41d   : > { %p2829_p4 = scmp.ne.s32.totalorder %s3771_s18, %s2828_s29  ;;  %p2833_p9 = scmp.lt.u32.totalorder %s3771_s18, %s3831_s7 }
 0x41e   : > { %p2834_p1 = scmp.lt.u32.totalorder %s2832_s17, %s2828_s29  ;;  %p2836_p6 = scmp.lt.u32.totalorder %s2828_s29, %s3771_s18 }
 0x41f   : > { %p2830_p5 = pnand %p2829_p4, %p3842_p11 }
 0x420   : > { %p2835_p3 = por %p2834_p1, %p2833_p9 }
 0x421   : > { %p2831_p7 = pneg %p2830_p5 }
 0x422   : > { %p2837_p12 = por %p2836_p6, %p2835_p3 }
 0x424   : > { %p2838_p13 = pnand %p2837_p12, %p2831_p7 }
 0x426   : > { %2841 = shalt.err (!%p2838_p13)
}
 0x427   : > { %s2889_s15 = smov 128  }
 0x428   : > { %2694 = dma.vmem_to_hbm [thread:$0]  (%p3842_p11), %s3775_s21, 4096, %s3771_s18, %s2153_s28, %s2889_s15, %s2889_s15, %s2885_s8  }
 0x429 PF: > { %s2181_s20 = sand.u32 1, %s2868_s24   ;;  %p3843_p8 = scmp.ne.s32.totalorder %s3836_s14, 0 }
 0x42a   : > { %p3844_p10 = scmp.ge.s32.totalorder %s2880_s27, 2  ;;  %s2182_s22 = scalar_lea.sflag [#allocation5], %s2181_s20 }
 0x42c   : > { %p2701_p0 = pnand %p3844_p10, %p3843_p8 }
 0x42e   : > { %2863 = dma.done.wait (!%p2701_p0), %s2182_s22, 4096  }
 0x42f   : > { %2865 = vsyncadd (!%p2701_p0), %s2182_s22, 4294963200  ;;  %p20_p2 = scmp.ge.s32.totalorder %s2955_s30, 4   ;;  %s3845_s24 = smov %s2872_s25 }
 0x430   : > { %s3846_s25 = smov %s2876_s26  ;;  %s3847_s26 = smov %s2967_s10 }
 0x431   : > { %s3848_s27 = smov %s2955_s30  ;;  %22 = sbr.rel (!%p20_p2) target bundleno = 5 (0x5), region = 95 }
 0x438   :  { %2187 = vsyncpa [#allocation4], 1 }
 0x439   :  { %2189 = vsyncpa [#allocation4 + $0x1], 1 }
 0x43a   :  { %2190 = vsyncpa [#allocation5], 1 }
 0x43b   :  { %2192 = vsyncpa [#allocation5 + $0x1], 1 }

</bundles_post_ra>
